<compile_context>
chip_gen: v6e
topology: v6e:2x2x1
jax: 0.10.0
libtpu: 0.0.40
codegen_flags: <defaults>
</compile_context>

<pallas_src>
import functools

import jax
import jax.numpy as jnp
from jax.experimental import pallas as pl
from jax.experimental.pallas import tpu as pltpu

EPS = 1e-5


# --------------------------------------------------------------------------- #
# In-kernel helpers
# --------------------------------------------------------------------------- #
def _lane_group_allsum(v, c):
    """v: [1, Wo*c] f32 with lane index = w*c + channel.

    Returns per-channel totals (summed over the Wo lane groups), already
    broadcast back to every group, via log2(Wo) cyclic lane rotations (XLU).
    Exact in f32 -- replaces the old Precision.HIGHEST p_mat MXU dots.
    """
    lanes = v.shape[-1]
    shift = c
    while shift < lanes:
        v = v + pltpu.roll(v, shift, 1)
        shift *= 2
    return v


def _bn_scale_offset(blocks, gamma, beta, c, inv_m):
    """Training-mode BatchNorm folded into per-lane scale/offset.

    Two-pass (mean first, then centered second moment) so there is no
    E[z^2]-E[z]^2 cancellation.  `blocks` is a list of [rows, Wo*c] f32 values
    that together cover the whole batch*spatial extent.
    """
    s1 = jnp.sum(blocks[0], axis=0, keepdims=True)
    for b in blocks[1:]:
        s1 = s1 + jnp.sum(b, axis=0, keepdims=True)
    mu = _lane_group_allsum(s1, c) * inv_m

    s2 = jnp.sum((blocks[0] - mu) ** 2, axis=0, keepdims=True)
    for b in blocks[1:]:
        s2 = s2 + jnp.sum((b - mu) ** 2, axis=0, keepdims=True)
    var = _lane_group_allsum(s2, c) * inv_m

    scale = gamma * jax.lax.rsqrt(var + EPS)
    offset = beta - mu * scale
    return scale, offset


def _conv1_bn1_relu_to_scratch(dims, lhs1_ref, w1_ref, g1_ref, be1_ref, y1p_ref):
    """conv1 (single lane-dense MXU matmul) + bn1 + relu1, result kept in VMEM."""
    n_img, ho, wo, c = dims
    lw = wo * c
    inv_m = 1.0 / float(n_img * ho * wo)

    z1 = jnp.dot(lhs1_ref[...], w1_ref[...],
                 preferred_element_type=jnp.float32)           # [N*Ho, Wo*C] f32
    sc1, of1 = _bn_scale_offset([z1], g1_ref[...], be1_ref[...], c, inv_m)
    y1 = jnp.maximum(z1 * sc1 + of1, 0.0).astype(jnp.bfloat16)

    # y1 never leaves VMEM: write into the zero-padded image scratch.
    y1p_ref[...] = jnp.zeros(y1p_ref.shape, y1p_ref.dtype)
    for n in range(n_img):
        y1p_ref[n, 1:1 + ho, c:c + lw] = y1[n * ho:(n + 1) * ho, :]


def _conv2_from_scratch(dims, y1p_ref, w2_ref):
    """conv2 as 9 shifted-tap matmuls straight out of the padded VMEM scratch."""
    n_img, ho, wo, c = dims
    lw = wo * c
    blocks = []
    for n in range(n_img):
        acc = jnp.zeros((ho, lw), jnp.float32)
        for kh in range(3):
            for kw in range(3):
                tap = y1p_ref[n, kh:kh + ho, kw * c:kw * c + lw]   # [Ho, Wo*C] bf16
                acc = acc + jnp.dot(tap, w2_ref[kh * 3 + kw],
                                    preferred_element_type=jnp.float32)
        blocks.append(acc)
    return blocks


# --------------------------------------------------------------------------- #
# Fused kernels (one pallas_call for the whole block)
# --------------------------------------------------------------------------- #
def fused_identity_kernel(dims, lhs1_ref, w1_ref, g1_ref, be1_ref,
                          w2_ref, g2_ref, be2_ref, xres_ref,
                          out_ref, y1p_ref):
    n_img, ho, wo, c = dims
    inv_m = 1.0 / float(n_img * ho * wo)

    _conv1_bn1_relu_to_scratch(dims, lhs1_ref, w1_ref, g1_ref, be1_ref, y1p_ref)
    z2_blocks = _conv2_from_scratch(dims, y1p_ref, w2_ref)
    sc2, of2 = _bn_scale_offset(z2_blocks, g2_ref[...], be2_ref[...], c, inv_m)

    for n in range(n_img):
        res = xres_ref[n * ho:(n + 1) * ho, :].astype(jnp.float32)
        out = jnp.maximum(z2_blocks[n] * sc2 + of2 + res, 0.0)
        out_ref[n * ho:(n + 1) * ho, :] = out.astype(out_ref.dtype)


def fused_downsample_kernel(dims, lhs1_ref, w1_ref, g1_ref, be1_ref,
                            w2_ref, g2_ref, be2_ref,
                            xs_ref, wd_ref, g3_ref, be3_ref,
                            out_ref, y1p_ref):
    n_img, ho, wo, c = dims
    inv_m = 1.0 / float(n_img * ho * wo)

    _conv1_bn1_relu_to_scratch(dims, lhs1_ref, w1_ref, g1_ref, be1_ref, y1p_ref)
    z2_blocks = _conv2_from_scratch(dims, y1p_ref, w2_ref)
    sc2, of2 = _bn_scale_offset(z2_blocks, g2_ref[...], be2_ref[...], c, inv_m)

    # 1x1 stride-2 downsample conv + bn3 residual (single lane-dense matmul).
    zd = jnp.dot(xs_ref[...], wd_ref[...], preferred_element_type=jnp.float32)
    sc3, of3 = _bn_scale_offset([zd], g3_ref[...], be3_ref[...], c, inv_m)

    for n in range(n_img):
        res = zd[n * ho:(n + 1) * ho, :] * sc3 + of3
        out = jnp.maximum(z2_blocks[n] * sc2 + of2 + res, 0.0)
        out_ref[n * ho:(n + 1) * ho, :] = out.astype(out_ref.dtype)


# --------------------------------------------------------------------------- #
# Wrapper: layout plumbing only (transpose / pad / im2col / fold / kron)
# --------------------------------------------------------------------------- #
def _im2col_3x3(x_nhwc, stride):
    """[N,H,W,C] (bf16) -> [N*Ho*Wo, 9*C] slab for a 3x3 conv with padding=1."""
    n, h, w, c = x_nhwc.shape
    ho = (h - 1) // stride + 1
    wo = (w - 1) // stride + 1
    m = n * ho * wo
    xp = jnp.pad(x_nhwc, ((0, 0), (1, 1), (1, 1), (0, 0)))
    taps = []
    for kh in range(3):
        for kw in range(3):
            taps.append(
                xp[:, kh:kh + stride * ho:stride, kw:kw + stride * wo:stride, :]
                .reshape(m, c))
    return jnp.concatenate(taps, axis=-1)


def residual_block_forward(x_nchw, params, en_downsample):
    # bf16 BEFORE im2col: the 9x slab is built / stored / DMA'd in bf16.
    x = jnp.transpose(x_nchw, (0, 2, 3, 1)).astype(jnp.bfloat16)   # NHWC
    n, h, w, cin = x.shape
    cout = params["w1"].shape[-1]
    s = 2 if en_downsample else 1
    ho = (h - 1) // s + 1
    wo = (w - 1) // s + 1
    m = n * ho * wo
    lw = wo * cout                                   # lane width (one image row)

    assert wo > 0 and (wo & (wo - 1)) == 0, "Wo must be a power of two (lane reduce)"
    assert lw <= 128, "W-fold assumes one image row fits 128 lanes (small Cout)"

    def fold_rows(a2d):                 # [M, K] -> [N*Ho, Wo*K]  (row-major reshape)
        return a2d.reshape(m // wo, wo * a2d.shape[-1])

    def fold_w(w2d):                    # [K, Cout] -> bf16 [Wo*K, Wo*Cout]
        return jnp.kron(jnp.eye(wo, dtype=jnp.float32),
                        w2d.astype(jnp.float32)).astype(jnp.bfloat16)

    def lane_vec(v):                    # [Cout] -> f32 [1, Wo*Cout]
        return jnp.tile(v.astype(jnp.float32)[None, :], (1, wo))

    # conv1 im2col slab (bf16, W-folded) and block-diagonal weights.
    lhs1 = fold_rows(_im2col_3x3(x, s))                           # [N*Ho, Wo*9*Cin]
    w1d = fold_w(params["w1"].reshape(9 * cin, cout))             # [Wo*9*Cin, Wo*C]
    w2d = jnp.stack([fold_w(params["w2"][kh, kw])
                     for kh in range(3) for kw in range(3)])      # [9, Wo*C, Wo*C]
    # NOTE: conv biases b1/b2/bd are intentionally NOT passed -- training-mode BN
    # subtracts the batch mean, so a per-channel pre-BN bias cancels exactly.
    ins = [lhs1, w1d, lane_vec(params["g1"]), lane_vec(params["be1"]),
           w2d, lane_vec(params["g2"]), lane_vec(params["be2"])]

    dims = (n, ho, wo, cout)
    if en_downsample:
        xs = x[:, ::2, ::2, :].reshape(m, cin)                    # 1x1 s2 input, bf16
        ins += [fold_rows(xs), fold_w(params["wd"]),
                lane_vec(params["g3"]), lane_vec(params["be3"])]
        kernel = functools.partial(fused_downsample_kernel, dims)
    else:
        assert cin == cout, "identity residual requires in_channels == out_channels"
        ins += [fold_rows(x.reshape(m, cout))]                    # bf16 residual
        kernel = functools.partial(fused_identity_kernel, dims)

    out_rows = n * ho
    out = pl.pallas_call(
        kernel,
        out_shape=jax.ShapeDtypeStruct((out_rows, lw), jnp.bfloat16),
        grid_spec=pltpu.PrefetchScalarGridSpec(
            num_scalar_prefetch=0,
            grid=(1,),
            in_specs=[pl.BlockSpec(a.shape, (lambda nd: (lambda i: (0,) * nd))(a.ndim))
                      for a in ins],
            out_specs=pl.BlockSpec((out_rows, lw), lambda i: (0, 0)),
            # Zero-padded y1 image scratch: conv2's taps are read straight from it.
            scratch_shapes=[pltpu.VMEM((n, ho + 2, (wo + 2) * cout), jnp.bfloat16)],
        ),
        compiler_params=pltpu.CompilerParams(
            dimension_semantics=("arbitrary",),
            vmem_limit_bytes=32 * 1024 * 1024),
    )(*ins)

    return (out.astype(jnp.float32)
            .reshape(n, ho, wo, cout)
            .transpose(0, 3, 1, 2))                               # NCHW


# --------------------------------------------------------------------------- #
# Params + pure-JAX reference (PyTorch training-mode BN semantics, with biases)
# --------------------------------------------------------------------------- #
def make_params(key, c_in, c_out, en_downsample):
    ks = jax.random.split(key, 6)
    p = {
        "w1": 0.1 * jax.random.normal(ks[0], (3, 3, c_in, c_out), jnp.float32),
        "b1": 0.05 * jax.random.normal(ks[1], (c_out,), jnp.float32),
        "w2": 0.1 * jax.random.normal(ks[2], (3, 3, c_out, c_out), jnp.float32),
        "b2": 0.05 * jax.random.normal(ks[3], (c_out,), jnp.float32),
        "g1": jnp.ones((c_out,), jnp.float32), "be1": jnp.zeros((c_out,), jnp.float32),
        "g2": jnp.ones((c_out,), jnp.float32), "be2": jnp.zeros((c_out,), jnp.float32),
    }
    if en_downsample:
        p["wd"] = 0.1 * jax.random.normal(ks[4], (c_in, c_out), jnp.float32)
        p["bd"] = 0.05 * jax.random.normal(ks[5], (c_out,), jnp.float32)
        p["g3"] = jnp.ones((c_out,), jnp.float32)
        p["be3"] = jnp.zeros((c_out,), jnp.float32)
    return p


def ref_forward(x_nchw, params, en_downsample):
    def conv(x, w_hwio, b, stride, pad):
        w = jnp.transpose(w_hwio, (3, 2, 0, 1))  # OIHW
        y = jax.lax.conv_general_dilated(
            x, w, (stride, stride), [(pad, pad), (pad, pad)],
            dimension_numbers=("NCHW", "OIHW", "NCHW"),
            precision=jax.lax.Precision.HIGHEST)
        return y + b[None, :, None, None]

    def bn(z, g, be):
        mu = z.mean(axis=(0, 2, 3), keepdims=True)
        var = ((z - mu) ** 2).mean(axis=(0, 2, 3), keepdims=True)
        return (g[None, :, None, None] * (z - mu) * jax.lax.rsqrt(var + EPS)
                + be[None, :, None, None])

    s = 2 if en_downsample else 1
    y = conv(x_nchw, params["w1"], params["b1"], s, 1)
    y = jax.nn.relu(bn(y, params["g1"], params["be1"]))
    y = conv(y, params["w2"], params["b2"], 1, 1)
    y = bn(y, params["g2"], params["be2"])
    if en_downsample:
        wd = params["wd"][None, None]  # [1,1,Cin,Cout] HWIO
        r = bn(conv(x_nchw, wd, params["bd"], 2, 0), params["g3"], params["be3"])
        y = y + r
    else:
        y = y + x_nchw
    return jax.nn.relu(y)


if __name__ == "__main__":
    key = jax.random.PRNGKey(0)
    kx1, kx2, kp1, kp2 = jax.random.split(key, 4)

    # Config A: en_downsample=False (identity residual, in == out channels)
    x1 = jax.random.normal(kx1, (2, 8, 16, 16), jnp.float32)        # NCHW
    p1 = make_params(kp1, 8, 8, False)
    y1 = residual_block_forward(x1, p1, False)
    jax.block_until_ready(y1)
    r1 = ref_forward(x1, p1, False)
    assert y1.shape == (2, 8, 16, 16)
    # tolerance: bf16 MXU operands / bf16 y1 scratch / bf16 output vs f32 HIGHEST ref
    assert jnp.allclose(y1, r1, atol=3e-2, rtol=3e-2), float(jnp.max(jnp.abs(y1 - r1)))

    # Config B: en_downsample=True (stride-2 convs, 4 -> 8 channels, 16x16 -> 8x8)
    x2 = jax.random.normal(kx2, (2, 4, 16, 16), jnp.float32)        # NCHW
    p2 = make_params(kp2, 4, 8, True)
    y2 = residual_block_forward(x2, p2, True)
    jax.block_until_ready(y2)
    r2 = ref_forward(x2, p2, True)
    assert y2.shape == (2, 8, 8, 8)
    assert jnp.allclose(y2, r2, atol=3e-2, rtol=3e-2), float(jnp.max(jnp.abs(y2 - r2)))

    print("KERNEL_OK")
</pallas_src>

<mosaic_0001>
module attributes {stable_mosaic.version = 11 : i64} {
  func.func @fused_identity_kernel(%arg0: i32, %arg1: memref<32x1152xbf16, #tpu.memory_space<vmem>>, %arg2: memref<1152x128xbf16, #tpu.memory_space<vmem>>, %arg3: memref<1x128xf32, #tpu.memory_space<vmem>>, %arg4: memref<1x128xf32, #tpu.memory_space<vmem>>, %arg5: memref<9x128x128xbf16, #tpu.memory_space<vmem>>, %arg6: memref<1x128xf32, #tpu.memory_space<vmem>>, %arg7: memref<1x128xf32, #tpu.memory_space<vmem>>, %arg8: memref<32x128xbf16, #tpu.memory_space<vmem>>, %arg9: memref<32x128xbf16, #tpu.memory_space<vmem>>, %arg10: memref<2x18x144xbf16, #tpu.memory_space<vmem>>) attributes {dimension_semantics = [#tpu.dimension_semantics<arbitrary>], iteration_bounds = array<i64: 1>, scalar_prefetch = 0 : i64, scratch_operands = 1 : i64, tpu.core_type = #tpu.core_type<tc>, window_params = [{pipeline_mode = #tpu.pipeline_mode<synchronous>, transform_indices = @transform_0, window_bounds = array<i64: 32, 1152>}, {pipeline_mode = #tpu.pipeline_mode<synchronous>, transform_indices = @transform_1, window_bounds = array<i64: 1152, 128>}, {pipeline_mode = #tpu.pipeline_mode<synchronous>, transform_indices = @transform_2, window_bounds = array<i64: 1, 128>}, {pipeline_mode = #tpu.pipeline_mode<synchronous>, transform_indices = @transform_3, window_bounds = array<i64: 1, 128>}, {pipeline_mode = #tpu.pipeline_mode<synchronous>, transform_indices = @transform_4, window_bounds = array<i64: 9, 128, 128>}, {pipeline_mode = #tpu.pipeline_mode<synchronous>, transform_indices = @transform_5, window_bounds = array<i64: 1, 128>}, {pipeline_mode = #tpu.pipeline_mode<synchronous>, transform_indices = @transform_6, window_bounds = array<i64: 1, 128>}, {pipeline_mode = #tpu.pipeline_mode<synchronous>, transform_indices = @transform_7, window_bounds = array<i64: 32, 128>}, {pipeline_mode = #tpu.pipeline_mode<synchronous>, transform_indices = @transform_8, window_bounds = array<i64: 32, 128>}]} {
    %c0 = arith.constant 0 : index
    %c0_0 = arith.constant 0 : index
    %0 = vector.load %arg1[%c0, %c0_0] : memref<32x1152xbf16, #tpu.memory_space<vmem>>, vector<32x1152xbf16>
    %c0_1 = arith.constant 0 : index
    %c0_2 = arith.constant 0 : index
    %1 = vector.load %arg2[%c0_1, %c0_2] : memref<1152x128xbf16, #tpu.memory_space<vmem>>, vector<1152x128xbf16>
    %cst = arith.constant dense<0.000000e+00> : vector<32x128xf32>
    %2 = tpu.matmul %0, %1, %cst {dimension_numbers = #tpu.dot_dimension_numbers<[1], [0], [0], [1], [0, 0, 1, 1], [], []>} : vector<32x1152xbf16>, vector<1152x128xbf16>, vector<32x128xf32> -> vector<32x128xf32>
    %c0_3 = arith.constant 0 : index
    %c0_4 = arith.constant 0 : index
    %3 = vector.load %arg3[%c0_3, %c0_4] : memref<1x128xf32, #tpu.memory_space<vmem>>, vector<1x128xf32>
    %c0_5 = arith.constant 0 : index
    %c0_6 = arith.constant 0 : index
    %4 = vector.load %arg4[%c0_5, %c0_6] : memref<1x128xf32, #tpu.memory_space<vmem>>, vector<1x128xf32>
    %cst_7 = arith.constant dense<0.000000e+00> : vector<128xf32>
    %5 = vector.multi_reduction <add>, %2, %cst_7 [0] : vector<32x128xf32> to vector<128xf32>
    %6 = vector.shape_cast %5 : vector<128xf32> to vector<1x128xf32>
    %c8_i32 = arith.constant 8 : i32
    %7 = tpu.dynamic_rotate %6 by %c8_i32 dim 1 : vector<1x128xf32>, i32 -> vector<1x128xf32>
    %8 = arith.addf %6, %7 : vector<1x128xf32>
    %c16_i32 = arith.constant 16 : i32
    %9 = tpu.dynamic_rotate %8 by %c16_i32 dim 1 : vector<1x128xf32>, i32 -> vector<1x128xf32>
    %10 = arith.addf %8, %9 : vector<1x128xf32>
    %c32_i32 = arith.constant 32 : i32
    %11 = tpu.dynamic_rotate %10 by %c32_i32 dim 1 : vector<1x128xf32>, i32 -> vector<1x128xf32>
    %12 = arith.addf %10, %11 : vector<1x128xf32>
    %c64_i32 = arith.constant 64 : i32
    %13 = tpu.dynamic_rotate %12 by %c64_i32 dim 1 : vector<1x128xf32>, i32 -> vector<1x128xf32>
    %14 = arith.addf %12, %13 : vector<1x128xf32>
    %cst_8 = arith.constant 0.001953125 : f32
    %15 = vector.broadcast %cst_8 : f32 to vector<1x128xf32>
    %16 = arith.mulf %14, %15 : vector<1x128xf32>
    %17 = vector.broadcast %16 : vector<1x128xf32> to vector<32x128xf32>
    %18 = arith.subf %2, %17 : vector<32x128xf32>
    %19 = arith.mulf %18, %18 : vector<32x128xf32>
    %cst_9 = arith.constant dense<0.000000e+00> : vector<128xf32>
    %20 = vector.multi_reduction <add>, %19, %cst_9 [0] : vector<32x128xf32> to vector<128xf32>
    %21 = vector.shape_cast %20 : vector<128xf32> to vector<1x128xf32>
    %c8_i32_10 = arith.constant 8 : i32
    %22 = tpu.dynamic_rotate %21 by %c8_i32_10 dim 1 : vector<1x128xf32>, i32 -> vector<1x128xf32>
    %23 = arith.addf %21, %22 : vector<1x128xf32>
    %c16_i32_11 = arith.constant 16 : i32
    %24 = tpu.dynamic_rotate %23 by %c16_i32_11 dim 1 : vector<1x128xf32>, i32 -> vector<1x128xf32>
    %25 = arith.addf %23, %24 : vector<1x128xf32>
    %c32_i32_12 = arith.constant 32 : i32
    %26 = tpu.dynamic_rotate %25 by %c32_i32_12 dim 1 : vector<1x128xf32>, i32 -> vector<1x128xf32>
    %27 = arith.addf %25, %26 : vector<1x128xf32>
    %c64_i32_13 = arith.constant 64 : i32
    %28 = tpu.dynamic_rotate %27 by %c64_i32_13 dim 1 : vector<1x128xf32>, i32 -> vector<1x128xf32>
    %29 = arith.addf %27, %28 : vector<1x128xf32>
    %cst_14 = arith.constant 0.001953125 : f32
    %30 = vector.broadcast %cst_14 : f32 to vector<1x128xf32>
    %31 = arith.mulf %29, %30 : vector<1x128xf32>
    %cst_15 = arith.constant 9.99999974E-6 : f32
    %32 = vector.broadcast %cst_15 : f32 to vector<1x128xf32>
    %33 = arith.addf %31, %32 : vector<1x128xf32>
    %34 = math.rsqrt %33 : vector<1x128xf32>
    %35 = arith.mulf %3, %34 : vector<1x128xf32>
    %36 = arith.mulf %16, %35 : vector<1x128xf32>
    %37 = arith.subf %4, %36 : vector<1x128xf32>
    %38 = vector.broadcast %35 : vector<1x128xf32> to vector<32x128xf32>
    %39 = arith.mulf %2, %38 : vector<32x128xf32>
    %40 = vector.broadcast %37 : vector<1x128xf32> to vector<32x128xf32>
    %41 = arith.addf %39, %40 : vector<32x128xf32>
    %cst_16 = arith.constant 0.000000e+00 : f32
    %42 = vector.broadcast %cst_16 : f32 to vector<32x128xf32>
    %43 = arith.maximumf %41, %42 : vector<32x128xf32>
    %44 = arith.truncf %43 : vector<32x128xf32> to vector<32x128xbf16>
    %cst_17 = arith.constant 0.000000e+00 : bf16
    %45 = vector.broadcast %cst_17 : bf16 to vector<2x18x144xbf16>
    %c0_18 = arith.constant 0 : index
    %c0_19 = arith.constant 0 : index
    %c0_20 = arith.constant 0 : index
    %46 = vector.load %arg10[%c0_18, %c0_19, %c0_20] : memref<2x18x144xbf16, #tpu.memory_space<vmem>>, vector<2x18x144xbf16>
    tpu.vector_store %arg10[%c0_18, %c0_19, %c0_20], %45 {strides = array<i32>} : memref<2x18x144xbf16, #tpu.memory_space<vmem>>, vector<2x18x144xbf16>,
    %47 = vector.extract_strided_slice %44 {offsets = [0, 0], sizes = [16, 128], strides = [1, 1]} : vector<32x128xbf16> to vector<16x128xbf16>
    %c0_21 = arith.constant 0 : index
    %c1 = arith.constant 1 : index
    %c8 = arith.constant 8 : index
    %48 = vector.load %arg10[%c0_21, %c1, %c8] : memref<2x18x144xbf16, #tpu.memory_space<vmem>>, vector<1x16x128xbf16>
    %49 = vector.shape_cast %48 : vector<1x16x128xbf16> to vector<16x128xbf16>
    %50 = vector.shape_cast %47 : vector<16x128xbf16> to vector<1x16x128xbf16>
    tpu.vector_store %arg10[%c0_21, %c1, %c8], %50 {strides = array<i32>} : memref<2x18x144xbf16, #tpu.memory_space<vmem>>, vector<1x16x128xbf16>,
    %51 = vector.extract_strided_slice %44 {offsets = [16, 0], sizes = [16, 128], strides = [1, 1]} : vector<32x128xbf16> to vector<16x128xbf16>
    %c1_22 = arith.constant 1 : index
    %c1_23 = arith.constant 1 : index
    %c8_24 = arith.constant 8 : index
    %52 = vector.load %arg10[%c1_22, %c1_23, %c8_24] : memref<2x18x144xbf16, #tpu.memory_space<vmem>>, vector<1x16x128xbf16>
    %53 = vector.shape_cast %52 : vector<1x16x128xbf16> to vector<16x128xbf16>
    %54 = vector.shape_cast %51 : vector<16x128xbf16> to vector<1x16x128xbf16>
    tpu.vector_store %arg10[%c1_22, %c1_23, %c8_24], %54 {strides = array<i32>} : memref<2x18x144xbf16, #tpu.memory_space<vmem>>, vector<1x16x128xbf16>,
    %cst_25 = arith.constant 0.000000e+00 : f32
    %55 = vector.broadcast %cst_25 : f32 to vector<16x128xf32>
    %c0_26 = arith.constant 0 : index
    %c0_27 = arith.constant 0 : index
    %c0_28 = arith.constant 0 : index
    %56 = vector.load %arg10[%c0_26, %c0_27, %c0_28] : memref<2x18x144xbf16, #tpu.memory_space<vmem>>, vector<1x16x128xbf16>
    %57 = vector.shape_cast %56 : vector<1x16x128xbf16> to vector<16x128xbf16>
    %c0_29 = arith.constant 0 : index
    %c0_30 = arith.constant 0 : index
    %c0_31 = arith.constant 0 : index
    %58 = vector.load %arg5[%c0_29, %c0_30, %c0_31] : memref<9x128x128xbf16, #tpu.memory_space<vmem>>, vector<1x128x128xbf16>
    %59 = vector.shape_cast %58 : vector<1x128x128xbf16> to vector<128x128xbf16>
    %cst_32 = arith.constant dense<0.000000e+00> : vector<16x128xf32>
    %60 = tpu.matmul %57, %59, %cst_32 {dimension_numbers = #tpu.dot_dimension_numbers<[1], [0], [0], [1], [0, 0, 1, 1], [], []>} : vector<16x128xbf16>, vector<128x128xbf16>, vector<16x128xf32> -> vector<16x128xf32>
    %61 = arith.addf %55, %60 : vector<16x128xf32>
    %c0_33 = arith.constant 0 : index
    %c0_34 = arith.constant 0 : index
    %c8_35 = arith.constant 8 : index
    %62 = vector.load %arg10[%c0_33, %c0_34, %c8_35] : memref<2x18x144xbf16, #tpu.memory_space<vmem>>, vector<1x16x128xbf16>
    %63 = vector.shape_cast %62 : vector<1x16x128xbf16> to vector<16x128xbf16>
    %c1_36 = arith.constant 1 : index
    %c0_37 = arith.constant 0 : index
    %c0_38 = arith.constant 0 : index
    %64 = vector.load %arg5[%c1_36, %c0_37, %c0_38] : memref<9x128x128xbf16, #tpu.memory_space<vmem>>, vector<1x128x128xbf16>
    %65 = vector.shape_cast %64 : vector<1x128x128xbf16> to vector<128x128xbf16>
    %cst_39 = arith.constant dense<0.000000e+00> : vector<16x128xf32>
    %66 = tpu.matmul %63, %65, %cst_39 {dimension_numbers = #tpu.dot_dimension_numbers<[1], [0], [0], [1], [0, 0, 1, 1], [], []>} : vector<16x128xbf16>, vector<128x128xbf16>, vector<16x128xf32> -> vector<16x128xf32>
    %67 = arith.addf %61, %66 : vector<16x128xf32>
    %c0_40 = arith.constant 0 : index
    %c0_41 = arith.constant 0 : index
    %c16 = arith.constant 16 : index
    %68 = vector.load %arg10[%c0_40, %c0_41, %c16] : memref<2x18x144xbf16, #tpu.memory_space<vmem>>, vector<1x16x128xbf16>
    %69 = vector.shape_cast %68 : vector<1x16x128xbf16> to vector<16x128xbf16>
    %c2 = arith.constant 2 : index
    %c0_42 = arith.constant 0 : index
    %c0_43 = arith.constant 0 : index
    %70 = vector.load %arg5[%c2, %c0_42, %c0_43] : memref<9x128x128xbf16, #tpu.memory_space<vmem>>, vector<1x128x128xbf16>
    %71 = vector.shape_cast %70 : vector<1x128x128xbf16> to vector<128x128xbf16>
    %cst_44 = arith.constant dense<0.000000e+00> : vector<16x128xf32>
    %72 = tpu.matmul %69, %71, %cst_44 {dimension_numbers = #tpu.dot_dimension_numbers<[1], [0], [0], [1], [0, 0, 1, 1], [], []>} : vector<16x128xbf16>, vector<128x128xbf16>, vector<16x128xf32> -> vector<16x128xf32>
    %73 = arith.addf %67, %72 : vector<16x128xf32>
    %c0_45 = arith.constant 0 : index
    %c1_46 = arith.constant 1 : index
    %c0_47 = arith.constant 0 : index
    %74 = vector.load %arg10[%c0_45, %c1_46, %c0_47] : memref<2x18x144xbf16, #tpu.memory_space<vmem>>, vector<1x16x128xbf16>
    %75 = vector.shape_cast %74 : vector<1x16x128xbf16> to vector<16x128xbf16>
    %c3 = arith.constant 3 : index
    %c0_48 = arith.constant 0 : index
    %c0_49 = arith.constant 0 : index
    %76 = vector.load %arg5[%c3, %c0_48, %c0_49] : memref<9x128x128xbf16, #tpu.memory_space<vmem>>, vector<1x128x128xbf16>
    %77 = vector.shape_cast %76 : vector<1x128x128xbf16> to vector<128x128xbf16>
    %cst_50 = arith.constant dense<0.000000e+00> : vector<16x128xf32>
    %78 = tpu.matmul %75, %77, %cst_50 {dimension_numbers = #tpu.dot_dimension_numbers<[1], [0], [0], [1], [0, 0, 1, 1], [], []>} : vector<16x128xbf16>, vector<128x128xbf16>, vector<16x128xf32> -> vector<16x128xf32>
    %79 = arith.addf %73, %78 : vector<16x128xf32>
    %c0_51 = arith.constant 0 : index
    %c1_52 = arith.constant 1 : index
    %c8_53 = arith.constant 8 : index
    %80 = vector.load %arg10[%c0_51, %c1_52, %c8_53] : memref<2x18x144xbf16, #tpu.memory_space<vmem>>, vector<1x16x128xbf16>
    %81 = vector.shape_cast %80 : vector<1x16x128xbf16> to vector<16x128xbf16>
    %c4 = arith.constant 4 : index
    %c0_54 = arith.constant 0 : index
    %c0_55 = arith.constant 0 : index
    %82 = vector.load %arg5[%c4, %c0_54, %c0_55] : memref<9x128x128xbf16, #tpu.memory_space<vmem>>, vector<1x128x128xbf16>
    %83 = vector.shape_cast %82 : vector<1x128x128xbf16> to vector<128x128xbf16>
    %cst_56 = arith.constant dense<0.000000e+00> : vector<16x128xf32>
    %84 = tpu.matmul %81, %83, %cst_56 {dimension_numbers = #tpu.dot_dimension_numbers<[1], [0], [0], [1], [0, 0, 1, 1], [], []>} : vector<16x128xbf16>, vector<128x128xbf16>, vector<16x128xf32> -> vector<16x128xf32>
    %85 = arith.addf %79, %84 : vector<16x128xf32>
    %c0_57 = arith.constant 0 : index
    %c1_58 = arith.constant 1 : index
    %c16_59 = arith.constant 16 : index
    %86 = vector.load %arg10[%c0_57, %c1_58, %c16_59] : memref<2x18x144xbf16, #tpu.memory_space<vmem>>, vector<1x16x128xbf16>
    %87 = vector.shape_cast %86 : vector<1x16x128xbf16> to vector<16x128xbf16>
    %c5 = arith.constant 5 : index
    %c0_60 = arith.constant 0 : index
    %c0_61 = arith.constant 0 : index
    %88 = vector.load %arg5[%c5, %c0_60, %c0_61] : memref<9x128x128xbf16, #tpu.memory_space<vmem>>, vector<1x128x128xbf16>
    %89 = vector.shape_cast %88 : vector<1x128x128xbf16> to vector<128x128xbf16>
    %cst_62 = arith.constant dense<0.000000e+00> : vector<16x128xf32>
    %90 = tpu.matmul %87, %89, %cst_62 {dimension_numbers = #tpu.dot_dimension_numbers<[1], [0], [0], [1], [0, 0, 1, 1], [], []>} : vector<16x128xbf16>, vector<128x128xbf16>, vector<16x128xf32> -> vector<16x128xf32>
    %91 = arith.addf %85, %90 : vector<16x128xf32>
    %c0_63 = arith.constant 0 : index
    %c2_64 = arith.constant 2 : index
    %c0_65 = arith.constant 0 : index
    %92 = vector.load %arg10[%c0_63, %c2_64, %c0_65] : memref<2x18x144xbf16, #tpu.memory_space<vmem>>, vector<1x16x128xbf16>
    %93 = vector.shape_cast %92 : vector<1x16x128xbf16> to vector<16x128xbf16>
    %c6 = arith.constant 6 : index
    %c0_66 = arith.constant 0 : index
    %c0_67 = arith.constant 0 : index
    %94 = vector.load %arg5[%c6, %c0_66, %c0_67] : memref<9x128x128xbf16, #tpu.memory_space<vmem>>, vector<1x128x128xbf16>
    %95 = vector.shape_cast %94 : vector<1x128x128xbf16> to vector<128x128xbf16>
    %cst_68 = arith.constant dense<0.000000e+00> : vector<16x128xf32>
    %96 = tpu.matmul %93, %95, %cst_68 {dimension_numbers = #tpu.dot_dimension_numbers<[1], [0], [0], [1], [0, 0, 1, 1], [], []>} : vector<16x128xbf16>, vector<128x128xbf16>, vector<16x128xf32> -> vector<16x128xf32>
    %97 = arith.addf %91, %96 : vector<16x128xf32>
    %c0_69 = arith.constant 0 : index
    %c2_70 = arith.constant 2 : index
    %c8_71 = arith.constant 8 : index
    %98 = vector.load %arg10[%c0_69, %c2_70, %c8_71] : memref<2x18x144xbf16, #tpu.memory_space<vmem>>, vector<1x16x128xbf16>
    %99 = vector.shape_cast %98 : vector<1x16x128xbf16> to vector<16x128xbf16>
    %c7 = arith.constant 7 : index
    %c0_72 = arith.constant 0 : index
    %c0_73 = arith.constant 0 : index
    %100 = vector.load %arg5[%c7, %c0_72, %c0_73] : memref<9x128x128xbf16, #tpu.memory_space<vmem>>, vector<1x128x128xbf16>
    %101 = vector.shape_cast %100 : vector<1x128x128xbf16> to vector<128x128xbf16>
    %cst_74 = arith.constant dense<0.000000e+00> : vector<16x128xf32>
    %102 = tpu.matmul %99, %101, %cst_74 {dimension_numbers = #tpu.dot_dimension_numbers<[1], [0], [0], [1], [0, 0, 1, 1], [], []>} : vector<16x128xbf16>, vector<128x128xbf16>, vector<16x128xf32> -> vector<16x128xf32>
    %103 = arith.addf %97, %102 : vector<16x128xf32>
    %c0_75 = arith.constant 0 : index
    %c2_76 = arith.constant 2 : index
    %c16_77 = arith.constant 16 : index
    %104 = vector.load %arg10[%c0_75, %c2_76, %c16_77] : memref<2x18x144xbf16, #tpu.memory_space<vmem>>, vector<1x16x128xbf16>
    %105 = vector.shape_cast %104 : vector<1x16x128xbf16> to vector<16x128xbf16>
    %c8_78 = arith.constant 8 : index
    %c0_79 = arith.constant 0 : index
    %c0_80 = arith.constant 0 : index
    %106 = vector.load %arg5[%c8_78, %c0_79, %c0_80] : memref<9x128x128xbf16, #tpu.memory_space<vmem>>, vector<1x128x128xbf16>
    %107 = vector.shape_cast %106 : vector<1x128x128xbf16> to vector<128x128xbf16>
    %cst_81 = arith.constant dense<0.000000e+00> : vector<16x128xf32>
    %108 = tpu.matmul %105, %107, %cst_81 {dimension_numbers = #tpu.dot_dimension_numbers<[1], [0], [0], [1], [0, 0, 1, 1], [], []>} : vector<16x128xbf16>, vector<128x128xbf16>, vector<16x128xf32> -> vector<16x128xf32>
    %109 = arith.addf %103, %108 : vector<16x128xf32>
    %cst_82 = arith.constant 0.000000e+00 : f32
    %110 = vector.broadcast %cst_82 : f32 to vector<16x128xf32>
    %c1_83 = arith.constant 1 : index
    %c0_84 = arith.constant 0 : index
    %c0_85 = arith.constant 0 : index
    %111 = vector.load %arg10[%c1_83, %c0_84, %c0_85] : memref<2x18x144xbf16, #tpu.memory_space<vmem>>, vector<1x16x128xbf16>
    %112 = vector.shape_cast %111 : vector<1x16x128xbf16> to vector<16x128xbf16>
    %c0_86 = arith.constant 0 : index
    %c0_87 = arith.constant 0 : index
    %c0_88 = arith.constant 0 : index
    %113 = vector.load %arg5[%c0_86, %c0_87, %c0_88] : memref<9x128x128xbf16, #tpu.memory_space<vmem>>, vector<1x128x128xbf16>
    %114 = vector.shape_cast %113 : vector<1x128x128xbf16> to vector<128x128xbf16>
    %cst_89 = arith.constant dense<0.000000e+00> : vector<16x128xf32>
    %115 = tpu.matmul %112, %114, %cst_89 {dimension_numbers = #tpu.dot_dimension_numbers<[1], [0], [0], [1], [0, 0, 1, 1], [], []>} : vector<16x128xbf16>, vector<128x128xbf16>, vector<16x128xf32> -> vector<16x128xf32>
    %116 = arith.addf %110, %115 : vector<16x128xf32>
    %c1_90 = arith.constant 1 : index
    %c0_91 = arith.constant 0 : index
    %c8_92 = arith.constant 8 : index
    %117 = vector.load %arg10[%c1_90, %c0_91, %c8_92] : memref<2x18x144xbf16, #tpu.memory_space<vmem>>, vector<1x16x128xbf16>
    %118 = vector.shape_cast %117 : vector<1x16x128xbf16> to vector<16x128xbf16>
    %c1_93 = arith.constant 1 : index
    %c0_94 = arith.constant 0 : index
    %c0_95 = arith.constant 0 : index
    %119 = vector.load %arg5[%c1_93, %c0_94, %c0_95] : memref<9x128x128xbf16, #tpu.memory_space<vmem>>, vector<1x128x128xbf16>
    %120 = vector.shape_cast %119 : vector<1x128x128xbf16> to vector<128x128xbf16>
    %cst_96 = arith.constant dense<0.000000e+00> : vector<16x128xf32>
    %121 = tpu.matmul %118, %120, %cst_96 {dimension_numbers = #tpu.dot_dimension_numbers<[1], [0], [0], [1], [0, 0, 1, 1], [], []>} : vector<16x128xbf16>, vector<128x128xbf16>, vector<16x128xf32> -> vector<16x128xf32>
    %122 = arith.addf %116, %121 : vector<16x128xf32>
    %c1_97 = arith.constant 1 : index
    %c0_98 = arith.constant 0 : index
    %c16_99 = arith.constant 16 : index
    %123 = vector.load %arg10[%c1_97, %c0_98, %c16_99] : memref<2x18x144xbf16, #tpu.memory_space<vmem>>, vector<1x16x128xbf16>
    %124 = vector.shape_cast %123 : vector<1x16x128xbf16> to vector<16x128xbf16>
    %c2_100 = arith.constant 2 : index
    %c0_101 = arith.constant 0 : index
    %c0_102 = arith.constant 0 : index
    %125 = vector.load %arg5[%c2_100, %c0_101, %c0_102] : memref<9x128x128xbf16, #tpu.memory_space<vmem>>, vector<1x128x128xbf16>
    %126 = vector.shape_cast %125 : vector<1x128x128xbf16> to vector<128x128xbf16>
    %cst_103 = arith.constant dense<0.000000e+00> : vector<16x128xf32>
    %127 = tpu.matmul %124, %126, %cst_103 {dimension_numbers = #tpu.dot_dimension_numbers<[1], [0], [0], [1], [0, 0, 1, 1], [], []>} : vector<16x128xbf16>, vector<128x128xbf16>, vector<16x128xf32> -> vector<16x128xf32>
    %128 = arith.addf %122, %127 : vector<16x128xf32>
    %c1_104 = arith.constant 1 : index
    %c1_105 = arith.constant 1 : index
    %c0_106 = arith.constant 0 : index
    %129 = vector.load %arg10[%c1_104, %c1_105, %c0_106] : memref<2x18x144xbf16, #tpu.memory_space<vmem>>, vector<1x16x128xbf16>
    %130 = vector.shape_cast %129 : vector<1x16x128xbf16> to vector<16x128xbf16>
    %c3_107 = arith.constant 3 : index
    %c0_108 = arith.constant 0 : index
    %c0_109 = arith.constant 0 : index
    %131 = vector.load %arg5[%c3_107, %c0_108, %c0_109] : memref<9x128x128xbf16, #tpu.memory_space<vmem>>, vector<1x128x128xbf16>
    %132 = vector.shape_cast %131 : vector<1x128x128xbf16> to vector<128x128xbf16>
    %cst_110 = arith.constant dense<0.000000e+00> : vector<16x128xf32>
    %133 = tpu.matmul %130, %132, %cst_110 {dimension_numbers = #tpu.dot_dimension_numbers<[1], [0], [0], [1], [0, 0, 1, 1], [], []>} : vector<16x128xbf16>, vector<128x128xbf16>, vector<16x128xf32> -> vector<16x128xf32>
    %134 = arith.addf %128, %133 : vector<16x128xf32>
    %c1_111 = arith.constant 1 : index
    %c1_112 = arith.constant 1 : index
    %c8_113 = arith.constant 8 : index
    %135 = vector.load %arg10[%c1_111, %c1_112, %c8_113] : memref<2x18x144xbf16, #tpu.memory_space<vmem>>, vector<1x16x128xbf16>
    %136 = vector.shape_cast %135 : vector<1x16x128xbf16> to vector<16x128xbf16>
    %c4_114 = arith.constant 4 : index
    %c0_115 = arith.constant 0 : index
    %c0_116 = arith.constant 0 : index
    %137 = vector.load %arg5[%c4_114, %c0_115, %c0_116] : memref<9x128x128xbf16, #tpu.memory_space<vmem>>, vector<1x128x128xbf16>
    %138 = vector.shape_cast %137 : vector<1x128x128xbf16> to vector<128x128xbf16>
    %cst_117 = arith.constant dense<0.000000e+00> : vector<16x128xf32>
    %139 = tpu.matmul %136, %138, %cst_117 {dimension_numbers = #tpu.dot_dimension_numbers<[1], [0], [0], [1], [0, 0, 1, 1], [], []>} : vector<16x128xbf16>, vector<128x128xbf16>, vector<16x128xf32> -> vector<16x128xf32>
    %140 = arith.addf %134, %139 : vector<16x128xf32>
    %c1_118 = arith.constant 1 : index
    %c1_119 = arith.constant 1 : index
    %c16_120 = arith.constant 16 : index
    %141 = vector.load %arg10[%c1_118, %c1_119, %c16_120] : memref<2x18x144xbf16, #tpu.memory_space<vmem>>, vector<1x16x128xbf16>
    %142 = vector.shape_cast %141 : vector<1x16x128xbf16> to vector<16x128xbf16>
    %c5_121 = arith.constant 5 : index
    %c0_122 = arith.constant 0 : index
    %c0_123 = arith.constant 0 : index
    %143 = vector.load %arg5[%c5_121, %c0_122, %c0_123] : memref<9x128x128xbf16, #tpu.memory_space<vmem>>, vector<1x128x128xbf16>
    %144 = vector.shape_cast %143 : vector<1x128x128xbf16> to vector<128x128xbf16>
    %cst_124 = arith.constant dense<0.000000e+00> : vector<16x128xf32>
    %145 = tpu.matmul %142, %144, %cst_124 {dimension_numbers = #tpu.dot_dimension_numbers<[1], [0], [0], [1], [0, 0, 1, 1], [], []>} : vector<16x128xbf16>, vector<128x128xbf16>, vector<16x128xf32> -> vector<16x128xf32>
    %146 = arith.addf %140, %145 : vector<16x128xf32>
    %c1_125 = arith.constant 1 : index
    %c2_126 = arith.constant 2 : index
    %c0_127 = arith.constant 0 : index
    %147 = vector.load %arg10[%c1_125, %c2_126, %c0_127] : memref<2x18x144xbf16, #tpu.memory_space<vmem>>, vector<1x16x128xbf16>
    %148 = vector.shape_cast %147 : vector<1x16x128xbf16> to vector<16x128xbf16>
    %c6_128 = arith.constant 6 : index
    %c0_129 = arith.constant 0 : index
    %c0_130 = arith.constant 0 : index
    %149 = vector.load %arg5[%c6_128, %c0_129, %c0_130] : memref<9x128x128xbf16, #tpu.memory_space<vmem>>, vector<1x128x128xbf16>
    %150 = vector.shape_cast %149 : vector<1x128x128xbf16> to vector<128x128xbf16>
    %cst_131 = arith.constant dense<0.000000e+00> : vector<16x128xf32>
    %151 = tpu.matmul %148, %150, %cst_131 {dimension_numbers = #tpu.dot_dimension_numbers<[1], [0], [0], [1], [0, 0, 1, 1], [], []>} : vector<16x128xbf16>, vector<128x128xbf16>, vector<16x128xf32> -> vector<16x128xf32>
    %152 = arith.addf %146, %151 : vector<16x128xf32>
    %c1_132 = arith.constant 1 : index
    %c2_133 = arith.constant 2 : index
    %c8_134 = arith.constant 8 : index
    %153 = vector.load %arg10[%c1_132, %c2_133, %c8_134] : memref<2x18x144xbf16, #tpu.memory_space<vmem>>, vector<1x16x128xbf16>
    %154 = vector.shape_cast %153 : vector<1x16x128xbf16> to vector<16x128xbf16>
    %c7_135 = arith.constant 7 : index
    %c0_136 = arith.constant 0 : index
    %c0_137 = arith.constant 0 : index
    %155 = vector.load %arg5[%c7_135, %c0_136, %c0_137] : memref<9x128x128xbf16, #tpu.memory_space<vmem>>, vector<1x128x128xbf16>
    %156 = vector.shape_cast %155 : vector<1x128x128xbf16> to vector<128x128xbf16>
    %cst_138 = arith.constant dense<0.000000e+00> : vector<16x128xf32>
    %157 = tpu.matmul %154, %156, %cst_138 {dimension_numbers = #tpu.dot_dimension_numbers<[1], [0], [0], [1], [0, 0, 1, 1], [], []>} : vector<16x128xbf16>, vector<128x128xbf16>, vector<16x128xf32> -> vector<16x128xf32>
    %158 = arith.addf %152, %157 : vector<16x128xf32>
    %c1_139 = arith.constant 1 : index
    %c2_140 = arith.constant 2 : index
    %c16_141 = arith.constant 16 : index
    %159 = vector.load %arg10[%c1_139, %c2_140, %c16_141] : memref<2x18x144xbf16, #tpu.memory_space<vmem>>, vector<1x16x128xbf16>
    %160 = vector.shape_cast %159 : vector<1x16x128xbf16> to vector<16x128xbf16>
    %c8_142 = arith.constant 8 : index
    %c0_143 = arith.constant 0 : index
    %c0_144 = arith.constant 0 : index
    %161 = vector.load %arg5[%c8_142, %c0_143, %c0_144] : memref<9x128x128xbf16, #tpu.memory_space<vmem>>, vector<1x128x128xbf16>
    %162 = vector.shape_cast %161 : vector<1x128x128xbf16> to vector<128x128xbf16>
    %cst_145 = arith.constant dense<0.000000e+00> : vector<16x128xf32>
    %163 = tpu.matmul %160, %162, %cst_145 {dimension_numbers = #tpu.dot_dimension_numbers<[1], [0], [0], [1], [0, 0, 1, 1], [], []>} : vector<16x128xbf16>, vector<128x128xbf16>, vector<16x128xf32> -> vector<16x128xf32>
    %164 = arith.addf %158, %163 : vector<16x128xf32>
    %c0_146 = arith.constant 0 : index
    %c0_147 = arith.constant 0 : index
    %165 = vector.load %arg6[%c0_146, %c0_147] : memref<1x128xf32, #tpu.memory_space<vmem>>, vector<1x128xf32>
    %c0_148 = arith.constant 0 : index
    %c0_149 = arith.constant 0 : index
    %166 = vector.load %arg7[%c0_148, %c0_149] : memref<1x128xf32, #tpu.memory_space<vmem>>, vector<1x128xf32>
    %cst_150 = arith.constant dense<0.000000e+00> : vector<128xf32>
    %167 = vector.multi_reduction <add>, %109, %cst_150 [0] : vector<16x128xf32> to vector<128xf32>
    %168 = vector.shape_cast %167 : vector<128xf32> to vector<1x128xf32>
    %cst_151 = arith.constant dense<0.000000e+00> : vector<128xf32>
    %169 = vector.multi_reduction <add>, %164, %cst_151 [0] : vector<16x128xf32> to vector<128xf32>
    %170 = vector.shape_cast %169 : vector<128xf32> to vector<1x128xf32>
    %171 = arith.addf %168, %170 : vector<1x128xf32>
    %c8_i32_152 = arith.constant 8 : i32
    %172 = tpu.dynamic_rotate %171 by %c8_i32_152 dim 1 : vector<1x128xf32>, i32 -> vector<1x128xf32>
    %173 = arith.addf %171, %172 : vector<1x128xf32>
    %c16_i32_153 = arith.constant 16 : i32
    %174 = tpu.dynamic_rotate %173 by %c16_i32_153 dim 1 : vector<1x128xf32>, i32 -> vector<1x128xf32>
    %175 = arith.addf %173, %174 : vector<1x128xf32>
    %c32_i32_154 = arith.constant 32 : i32
    %176 = tpu.dynamic_rotate %175 by %c32_i32_154 dim 1 : vector<1x128xf32>, i32 -> vector<1x128xf32>
    %177 = arith.addf %175, %176 : vector<1x128xf32>
    %c64_i32_155 = arith.constant 64 : i32
    %178 = tpu.dynamic_rotate %177 by %c64_i32_155 dim 1 : vector<1x128xf32>, i32 -> vector<1x128xf32>
    %179 = arith.addf %177, %178 : vector<1x128xf32>
    %cst_156 = arith.constant 0.001953125 : f32
    %180 = vector.broadcast %cst_156 : f32 to vector<1x128xf32>
    %181 = arith.mulf %179, %180 : vector<1x128xf32>
    %182 = vector.broadcast %181 : vector<1x128xf32> to vector<16x128xf32>
    %183 = arith.subf %109, %182 : vector<16x128xf32>
    %184 = arith.mulf %183, %183 : vector<16x128xf32>
    %cst_157 = arith.constant dense<0.000000e+00> : vector<128xf32>
    %185 = vector.multi_reduction <add>, %184, %cst_157 [0] : vector<16x128xf32> to vector<128xf32>
    %186 = vector.shape_cast %185 : vector<128xf32> to vector<1x128xf32>
    %187 = vector.broadcast %181 : vector<1x128xf32> to vector<16x128xf32>
    %188 = arith.subf %164, %187 : vector<16x128xf32>
    %189 = arith.mulf %188, %188 : vector<16x128xf32>
    %cst_158 = arith.constant dense<0.000000e+00> : vector<128xf32>
    %190 = vector.multi_reduction <add>, %189, %cst_158 [0] : vector<16x128xf32> to vector<128xf32>
    %191 = vector.shape_cast %190 : vector<128xf32> to vector<1x128xf32>
    %192 = arith.addf %186, %191 : vector<1x128xf32>
    %c8_i32_159 = arith.constant 8 : i32
    %193 = tpu.dynamic_rotate %192 by %c8_i32_159 dim 1 : vector<1x128xf32>, i32 -> vector<1x128xf32>
    %194 = arith.addf %192, %193 : vector<1x128xf32>
    %c16_i32_160 = arith.constant 16 : i32
    %195 = tpu.dynamic_rotate %194 by %c16_i32_160 dim 1 : vector<1x128xf32>, i32 -> vector<1x128xf32>
    %196 = arith.addf %194, %195 : vector<1x128xf32>
    %c32_i32_161 = arith.constant 32 : i32
    %197 = tpu.dynamic_rotate %196 by %c32_i32_161 dim 1 : vector<1x128xf32>, i32 -> vector<1x128xf32>
    %198 = arith.addf %196, %197 : vector<1x128xf32>
    %c64_i32_162 = arith.constant 64 : i32
    %199 = tpu.dynamic_rotate %198 by %c64_i32_162 dim 1 : vector<1x128xf32>, i32 -> vector<1x128xf32>
    %200 = arith.addf %198, %199 : vector<1x128xf32>
    %cst_163 = arith.constant 0.001953125 : f32
    %201 = vector.broadcast %cst_163 : f32 to vector<1x128xf32>
    %202 = arith.mulf %200, %201 : vector<1x128xf32>
    %cst_164 = arith.constant 9.99999974E-6 : f32
    %203 = vector.broadcast %cst_164 : f32 to vector<1x128xf32>
    %204 = arith.addf %202, %203 : vector<1x128xf32>
    %205 = math.rsqrt %204 : vector<1x128xf32>
    %206 = arith.mulf %165, %205 : vector<1x128xf32>
    %207 = arith.mulf %181, %206 : vector<1x128xf32>
    %208 = arith.subf %166, %207 : vector<1x128xf32>
    %c0_165 = arith.constant 0 : index
    %c0_166 = arith.constant 0 : index
    %209 = vector.load %arg8[%c0_165, %c0_166] : memref<32x128xbf16, #tpu.memory_space<vmem>>, vector<16x128xbf16>
    %210 = arith.extf %209 : vector<16x128xbf16> to vector<16x128xf32>
    %211 = vector.broadcast %206 : vector<1x128xf32> to vector<16x128xf32>
    %212 = arith.mulf %109, %211 : vector<16x128xf32>
    %213 = vector.broadcast %208 : vector<1x128xf32> to vector<16x128xf32>
    %214 = arith.addf %212, %213 : vector<16x128xf32>
    %215 = arith.addf %214, %210 : vector<16x128xf32>
    %cst_167 = arith.constant 0.000000e+00 : f32
    %216 = vector.broadcast %cst_167 : f32 to vector<16x128xf32>
    %217 = arith.maximumf %215, %216 : vector<16x128xf32>
    %218 = arith.truncf %217 : vector<16x128xf32> to vector<16x128xbf16>
    %c0_168 = arith.constant 0 : index
    %c0_169 = arith.constant 0 : index
    %219 = vector.load %arg9[%c0_168, %c0_169] : memref<32x128xbf16, #tpu.memory_space<vmem>>, vector<16x128xbf16>
    tpu.vector_store %arg9[%c0_168, %c0_169], %218 {strides = array<i32>} : memref<32x128xbf16, #tpu.memory_space<vmem>>, vector<16x128xbf16>,
    %c16_170 = arith.constant 16 : index
    %c0_171 = arith.constant 0 : index
    %220 = vector.load %arg8[%c16_170, %c0_171] : memref<32x128xbf16, #tpu.memory_space<vmem>>, vector<16x128xbf16>
    %221 = arith.extf %220 : vector<16x128xbf16> to vector<16x128xf32>
    %222 = vector.broadcast %206 : vector<1x128xf32> to vector<16x128xf32>
    %223 = arith.mulf %164, %222 : vector<16x128xf32>
    %224 = vector.broadcast %208 : vector<1x128xf32> to vector<16x128xf32>
    %225 = arith.addf %223, %224 : vector<16x128xf32>
    %226 = arith.addf %225, %221 : vector<16x128xf32>
    %cst_172 = arith.constant 0.000000e+00 : f32
    %227 = vector.broadcast %cst_172 : f32 to vector<16x128xf32>
    %228 = arith.maximumf %226, %227 : vector<16x128xf32>
    %229 = arith.truncf %228 : vector<16x128xf32> to vector<16x128xbf16>
    %c16_173 = arith.constant 16 : index
    %c0_174 = arith.constant 0 : index
    %230 = vector.load %arg9[%c16_173, %c0_174] : memref<32x128xbf16, #tpu.memory_space<vmem>>, vector<16x128xbf16>
    tpu.vector_store %arg9[%c16_173, %c0_174], %229 {strides = array<i32>} : memref<32x128xbf16, #tpu.memory_space<vmem>>, vector<16x128xbf16>,
    return
  }
  func.func @transform_0(%arg0: i32) -> (i32, i32) {
    %c0_i32 = arith.constant 0 : i32
    %c0_i32_0 = arith.constant 0 : i32
    %c0_i32_1 = arith.constant 0 : i32
    return %c0_i32, %c0_i32_0 : i32, i32
  }
  func.func @transform_1(%arg0: i32) -> (i32, i32) {
    %c0_i32 = arith.constant 0 : i32
    %c0_i32_0 = arith.constant 0 : i32
    %c0_i32_1 = arith.constant 0 : i32
    return %c0_i32, %c0_i32_0 : i32, i32
  }
  func.func @transform_2(%arg0: i32) -> (i32, i32) {
    %c0_i32 = arith.constant 0 : i32
    %c0_i32_0 = arith.constant 0 : i32
    %c0_i32_1 = arith.constant 0 : i32
    return %c0_i32, %c0_i32_0 : i32, i32
  }
  func.func @transform_3(%arg0: i32) -> (i32, i32) {
    %c0_i32 = arith.constant 0 : i32
    %c0_i32_0 = arith.constant 0 : i32
    %c0_i32_1 = arith.constant 0 : i32
    return %c0_i32, %c0_i32_0 : i32, i32
  }
  func.func @transform_4(%arg0: i32) -> (i32, i32, i32) {
    %c0_i32 = arith.constant 0 : i32
    %c0_i32_0 = arith.constant 0 : i32
    %c0_i32_1 = arith.constant 0 : i32
    %c0_i32_2 = arith.constant 0 : i32
    return %c0_i32, %c0_i32_0, %c0_i32_1 : i32, i32, i32
  }
  func.func @transform_5(%arg0: i32) -> (i32, i32) {
    %c0_i32 = arith.constant 0 : i32
    %c0_i32_0 = arith.constant 0 : i32
    %c0_i32_1 = arith.constant 0 : i32
    return %c0_i32, %c0_i32_0 : i32, i32
  }
  func.func @transform_6(%arg0: i32) -> (i32, i32) {
    %c0_i32 = arith.constant 0 : i32
    %c0_i32_0 = arith.constant 0 : i32
    %c0_i32_1 = arith.constant 0 : i32
    return %c0_i32, %c0_i32_0 : i32, i32
  }
  func.func @transform_7(%arg0: i32) -> (i32, i32) {
    %c0_i32 = arith.constant 0 : i32
    %c0_i32_0 = arith.constant 0 : i32
    %c0_i32_1 = arith.constant 0 : i32
    return %c0_i32, %c0_i32_0 : i32, i32
  }
  func.func @transform_8(%arg0: i32) -> (i32, i32) {
    %c0_i32 = arith.constant 0 : i32
    %c0_i32_0 = arith.constant 0 : i32
    %c0_i32_1 = arith.constant 0 : i32
    return %c0_i32, %c0_i32_0 : i32, i32
  }
}

</mosaic_0001>

<bundles_post_ra>
// kernel: tpu_custom_call.1
= control target key start
LH: loop header
LB: loop body
LE: loop exit
PB: predicated region body
PF: predicated region fallthrough
CT: control target
= control target key end

     0   :  { %13 = vsyncpa [#allocation4], 0  ;;  %s5035_s0 = inlined_call_operand.hbm [shape: bf16[32,1152], index: 0, kind: input, shape index: {}]   ;;  %s5036_s1 = inlined_call_operand.hbm [shape: bf16[1152,128], index: 1, kind: input, shape index: {}]   ;;  %s5037_s2 = inlined_call_operand.vmem [shape: f32[1,128], index: 2, kind: input, shape index: {}]   ;;  %s5038_s3 = inlined_call_operand.vmem [shape: f32[1,128], index: 3, kind: input, shape index: {}]   ;;  %s5039_s4 = inlined_call_operand.hbm [shape: bf16[9,128,128], index: 4, kind: input, shape index: {}]   ;;  %s5040_s5 = inlined_call_operand.vmem [shape: f32[1,128], index: 5, kind: input, shape index: {}]   ;;  %s5041_s6 = inlined_call_operand.vmem [shape: f32[1,128], index: 6, kind: input, shape index: {}]   ;;  %s5042_s7 = inlined_call_operand.hbm [shape: bf16[32,128], index: 7, kind: input, shape index: {}]   ;;  %s5043_s8 = inlined_call_operand.hbm [shape: bf16[32,128], index: 8, kind: output, shape index: {}]  }
   0x1   :  { %14 = vsyncpa [#allocation7], 0 }
   0x2   :  { %15 = vsyncpa [#allocation10], 0 }
   0x3   :  { %16 = vsyncpa [#allocation5], 0  ;;  %s4209_s27 = smov [#allocation6]  }
   0x4   :  { %s34_s28 = sshll.u32 %s4209_s27, 4  ;;  %s35_s28 = int_to_ptr.vmem [resolvable:$true] %s34_s28 }
   0x5   :  { %s4109_s29 = scalar_lea.vmem %s35_s28, 9216  ;;  %p4114_p1 = scmp.lt.s32.totalorder %s35_s28, %s35_s28 }
   0x6   :  { %p4110_p0 = scmp.ne.s32.totalorder %s35_s28, %s4109_s29  ;;  %p4115_p2 = scmp.lt.s32.totalorder %s4109_s29, %s4109_s29 }
   0x8   :  { %p4116_p3 = por %p4115_p2, %p4114_p1 }
   0xa   :  { %p4117_p4 = pnand %p4116_p3, %p4110_p0 }
   0xc   :  { %4120 = shalt.err (!%p4117_p4)
}
   0xd   :  { %s4210_s30 = smov 64   ;;  %s4211_s9 = smov 4  }
   0xe   :  { %40 = dma.hbm_to_vmem [thread:$0]  %s5036_s1, 9216, %s35_s28, [#allocation7], %s4210_s30, %s4210_s30, %s4211_s9  }
   0xf   :  { %s4212_s12 = smov [#allocation3]  }
  0x10   :  { %s22_s13 = sshll.u32 %s4212_s12, 4  ;;  %s23_s13 = int_to_ptr.vmem [resolvable:$true] %s22_s13 }
  0x11   :  { %s4129_s14 = scalar_lea.vmem %s23_s13, 2304  ;;  %p4134_p6 = scmp.lt.s32.totalorder %s23_s13, %s23_s13 }
  0x12   :  { %p4130_p5 = scmp.ne.s32.totalorder %s23_s13, %s4129_s14  ;;  %p4135_p7 = scmp.lt.s32.totalorder %s4129_s14, %s4129_s14 }
  0x14   :  { %p4136_p8 = por %p4135_p7, %p4134_p6 }
  0x16   :  { %p4137_p9 = pnand %p4136_p8, %p4130_p5 }
  0x18   :  { %4140 = shalt.err (!%p4137_p9)
}
  0x19   :  { %s4213_s15 = smov 576   ;;  %s4214_s16 = smov 36  }
  0x1a   :  { %28 = dma.hbm_to_vmem [thread:$0]  %s5035_s0, 2304, %s23_s13, [#allocation4], %s4213_s15, %s4213_s15, %s4214_s16  }
  0x1b   :  { %s4215_s19 = smov [#allocation8]   ;;  %s4216_s21 = smov [#allocation9]  }
  0x1c   :  { %s50_s20 = sshll.u32 %s4215_s19, 4  ;;  %s66_s1 = sshll.u32 %s4216_s21, 4  ;;  %s51_s20 = int_to_ptr.vmem [resolvable:$true] %s50_s20  ;;  %s67_s1 = int_to_ptr.vmem [resolvable:$true] %s66_s1 }
  0x1d   :  { %s4149_s22 = scalar_lea.vmem %s51_s20, 9216  ;;  %p4154_p11 = scmp.lt.s32.totalorder %s51_s20, %s51_s20 }
  0x1e   :  { %p4150_p10 = scmp.ne.s32.totalorder %s51_s20, %s4149_s22  ;;  %p4155_p12 = scmp.lt.s32.totalorder %s4149_s22, %s4149_s22 }
  0x20   :  { %p4156_p13 = por %p4155_p12, %p4154_p11 }
  0x22   :  { %p4157_p0 = pnand %p4156_p13, %p4150_p10 }
  0x24   :  { %4160 = shalt.err (!%p4157_p0)
}
  0x25   :  { %56 = dma.hbm_to_vmem [thread:$0]  %s5039_s4, 9216, %s51_s20, [#allocation7], %s4210_s30, %s4210_s30, %s4211_s9  }
  0x26   :  { %s4169_s0 = scalar_lea.vmem %s67_s1, 256  ;;  %p4174_p2 = scmp.lt.s32.totalorder %s67_s1, %s67_s1 }
  0x27   :  { %p4170_p1 = scmp.ne.s32.totalorder %s67_s1, %s4169_s0  ;;  %p4175_p3 = scmp.lt.s32.totalorder %s4169_s0, %s4169_s0 }
  0x29   :  { %p4176_p4 = por %p4175_p3, %p4174_p2 }
  0x2b   :  { %p4177_p5 = pnand %p4176_p4, %p4170_p1 }
  0x2d   :  { %4180 = shalt.err (!%p4177_p5)
}
  0x2e   :  { %72 = dma.hbm_to_vmem [thread:$0]  %s5042_s7, 256, %s67_s1, [#allocation10], %s4210_s30, %s4210_s30, %s4211_s9  }
  0x2f   :  { %4201 = dma.done.wait [#allocation4], 2304  }
  0x30   :  { %4202 = vsyncadd [#allocation4], 4294964992 }
  0x31   :  { %4203 = dma.done.wait [#allocation7], 18432  }
  0x32   :  { %4204 = vsyncadd [#allocation7], 4294948864 }
  0x33   :  { %4205 = dma.done.wait [#allocation10], 256  }
  0x34   :  { %4206 = vsyncadd [#allocation10], 4294967040  ;;  %v3912_v0 = vld [vmem:[#allocation6 + $0x78] sm:$0xff]   ;;  %v3916_v4 = vld [vmem:[#allocation6 + $0x70] sm:$0xff]   ;;  %s4217_s4 = smov 8   ;;  %s4218_s7 = smov 16  }
  0x35   :  { %v3913_v1 = vld [vmem:[#allocation6 + $0xf8] sm:$0xff]   ;;  %3231 = vmatprep.subr.bf16.mxu0 %v3912_v0  ;;  %v3917_v5 = vld [vmem:[#allocation6 + $0xf0] sm:$0xff]   ;;  %v3920_v8 = vld [vmem:[#allocation6 + $0x68] sm:$0xff]   ;;  %s4219_s27 = smov 32   ;;  %vm1108_vm0 = vcmask 1043456   ;;  %vm1109_vm1 = vcmask 130052  }
  0x36   :  { %v3914_v2 = vld [vmem:[#allocation6 + $0x38] sm:$0xff]   ;;  %3259 = vmatprep.subr.bf16.mxu1 %v3913_v1  ;;  %v3918_v6 = vld [vmem:[#allocation6 + $0x30] sm:$0xff]   ;;  %v3921_v9 = vld [vmem:[#allocation6 + $0xe8] sm:$0xff]   ;;  %vm1113_vm3 = vcmask 1040384   ;;  %vm1114_vm4 = vcmask 126980   ;;  %vm4222_vm8 = vmmov 0  }
  0x37   :  { %v3915_v3 = vld [vmem:[#allocation6 + $0xb8] sm:$0xff]   ;;  %3232 = vmatpush3.bf16.msra.mxu0 %v3914_v2  ;;  %v3919_v7 = vld [vmem:[#allocation6 + $0xb0] sm:$0xff]   ;;  %v3922_v10 = vld [vmem:[#allocation6 + $0x28] sm:$0xff]   ;;  %vm1125_vm6 = vsmask.f32 256  ;;  %vm1161_vm10 = vcmask 1043520  }
  0x38   :  { %3260 = vmatpush3.bf16.msra.mxu1 %v3915_v3  ;;  %3233 = vmatprep.subr.bf16.mxu0 %v3916_v4  ;;  %v3923_v11 = vld [vmem:[#allocation6 + $0xa8] sm:$0xff]   ;;  %v3924_v12 = vld [vmem:[#allocation6 + $0x60] sm:$0xff]   ;;  %v3928_v16 = vld [vmem:[#allocation6 + $0x58] sm:$0xff]   ;;  %vm1126_vm7 = vsmask.f32 4368  ;;  %vm1164_vm12 = vcmask 64516  }
  0x39   :  { %3261 = vmatprep.subr.bf16.mxu1 %v3917_v5  ;;  %v3925_v13 = vld [vmem:[#allocation6 + $0xe0] sm:$0xff]   ;;  %v3929_v17 = vld [vmem:[#allocation6 + $0xd8] sm:$0xff]   ;;  %v3932_v20 = vld [vmem:[#allocation6 + $0x50] sm:$0xff]   ;;  %vm1162_vm11 = vsmask.f32 7938  ;;  %vm1175_vm14 = vcmask 1040448  }
  0x3a   :  { %v3926_v14 = vld [vmem:[#allocation6 + $0x20] sm:$0xff]   ;;  %v3930_v18 = vld [vmem:[#allocation6 + $0x18] sm:$0xff]   ;;  %v3933_v21 = vld [vmem:[#allocation6 + $0xd0] sm:$0xff]   ;;  %vm1165_vm13 = vsmask.f32 7954 }
  0x3b   :  { %3234 = vmatpush3.bf16.msra.mxu0 %v3918_v6  ;;  %v3927_v15 = vld [vmem:[#allocation6 + $0xa0] sm:$0xff]   ;;  %v3931_v19 = vld [vmem:[#allocation6 + $0x98] sm:$0xff]   ;;  %v3934_v22 = vld [vmem:[#allocation6 + $0x10] sm:$0xff]  }
  0x3c   :  { %3262 = vmatpush3.bf16.msra.mxu1 %v3919_v7  ;;  %3235 = vmatprep.subr.bf16.mxu0 %v3920_v8  ;;  %v3935_v23 = vld [vmem:[#allocation6 + $0x90] sm:$0xff]   ;;  %v3936_v24 = vld [vmem:[#allocation6 + $0x48] sm:$0xff]   ;;  %v3940_v28 = vld [vmem:[#allocation6 + $0x40] sm:$0xff]  }
  0x3d   :  { %3263 = vmatprep.subr.bf16.mxu1 %v3921_v9  ;;  %v3937_v25 = vld [vmem:[#allocation6 + $0xc8] sm:$0xff]   ;;  %v3941_v29 = vld [vmem:[#allocation6 + $0xc0] sm:$0xff]   ;;  %v3944_v32 = vld [vmem:[#allocation3] ss:$36 sps:$4 sm:$0xff]  }
  0x3e   :  { %v3938_v26 = vld [vmem:[#allocation6 + $0x8] sm:$0xff]   ;;  %v3942_v30 = vld [vmem:[#allocation6] sm:$0xff]   ;;  %v3946_v33 = vld [vmem:[#allocation3 + $0x4] ss:$36 sps:$4 sm:$0xff]  }
  0x3f   :  { %3236 = vmatpush3.bf16.msra.mxu0 %v3922_v10  ;;  %v3939_v27 = vld [vmem:[#allocation6 + $0x88] sm:$0xff]   ;;  %v3943_v31 = vld [vmem:[#allocation6 + $0x80] sm:$0xff]   ;;  %v3947_v34 = vld [vmem:[#allocation3 + $0x8] ss:$36 sps:$4 sm:$0xff]   ;;  %806 = vmatprep.mubr.bf16.mxu0 %v3946_v33 }
  0x40   :  { %3264 = vmatpush3.bf16.msra.mxu1 %v3923_v11  ;;  %3237 = vmatprep.subr.bf16.mxu0 %v3924_v12  ;;  %v3949_v35 = vld [vmem:[#allocation3 + $0xc] ss:$36 sps:$4 sm:$0xff]   ;;  %v3954_v40 = vld [vmem:[#allocation6 + $0x170] sm:$0xff]   ;;  %v3958_v44 = vld [vmem:[#allocation6 + $0x168] sm:$0xff]  }
  0x41   :  { %3265 = vmatprep.subr.bf16.mxu1 %v3925_v13  ;;  %v3950_v36 = vld [vmem:[#allocation6 + $0x178] sm:$0xff]   ;;  %855 = vmatprep.mubr.bf16.mxu1 %v3949_v35  ;;  %v3955_v41 = vld [vmem:[#allocation6 + $0x130] sm:$0xff]   ;;  %v3959_v45 = vld [vmem:[#allocation6 + $0x128] sm:$0xff]  }
  0x42   :  { %v3951_v37 = vld [vmem:[#allocation6 + $0x138] sm:$0xff]   ;;  %v3956_v42 = vld [vmem:[#allocation6 + $0x1f0] sm:$0xff]   ;;  %v3960_v46 = vld [vmem:[#allocation6 + $0x1e8] sm:$0xff]  }
  0x43   :  { %3238 = vmatpush3.bf16.msra.mxu0 %v3926_v14  ;;  %v3952_v38 = vld [vmem:[#allocation6 + $0x1f8] sm:$0xff]   ;;  %v3957_v43 = vld [vmem:[#allocation6 + $0x1b0] sm:$0xff]   ;;  %v3961_v47 = vld [vmem:[#allocation6 + $0x1a8] sm:$0xff]  }
  0x44   :  { %3266 = vmatpush3.bf16.msra.mxu1 %v3927_v15  ;;  %3239 = vmatprep.subr.bf16.mxu0 %v3928_v16  ;;  %v3953_v39 = vld [vmem:[#allocation6 + $0x1b8] sm:$0xff]   ;;  %v3962_v48 = vld [vmem:[#allocation6 + $0x160] sm:$0xff]   ;;  %v3976_v60 = vld [vmem:[#allocation6 + $0x150] sm:$0xff]  }
  0x45   :  { %3267 = vmatprep.subr.bf16.mxu1 %v3929_v17  ;;  %v3963_v49 = vld [vmem:[#allocation6 + $0x120] sm:$0xff]   ;;  %v3966_v52 = vld [vmem:[#allocation6 + $0x158] sm:$0xff]   ;;  %v3977_v61 = vld [vmem:[#allocation6 + $0x110] sm:$0xff]  }
  0x46   :  { %v3964_v50 = vld [vmem:[#allocation6 + $0x1e0] sm:$0xff]   ;;  %v3967_v53 = vld [vmem:[#allocation6 + $0x118] sm:$0xff]   ;;  %v3978_v62 = vld [vmem:[#allocation6 + $0x1d0] sm:$0xff]  }
  0x47   :  { %3240 = vmatpush3.bf16.msra.mxu0 %v3930_v18  ;;  %v3965_v51 = vld [vmem:[#allocation6 + $0x1a0] sm:$0xff]   ;;  %v3972_v56 = vld [vmem:[#allocation6 + $0x1d8] sm:$0xff]   ;;  %v3979_v63 = vld [vmem:[#allocation6 + $0x190] sm:$0xff]  }
  0x48   :  { %3268 = vmatpush3.bf16.msra.mxu1 %v3931_v19  ;;  %3241 = vmatprep.subr.bf16.mxu0 %v3932_v20  ;;  %v3968_v54 = vld [vmem:[#allocation3 + $0x4c] ss:$36 sps:$4 sm:$0xff]   ;;  %v3970_v55 = vld [vmem:[#allocation3 + $0x54] ss:$36 sps:$4 sm:$0xff]   ;;  %v3994_v12 = vld [vmem:[#allocation3 + $0x1c] ss:$36 sps:$4 sm:$0xff]  }
  0x49   :  { %3269 = vmatprep.subr.bf16.mxu1 %v3933_v21  ;;  %v3973_v57 = vld [vmem:[#allocation3 + $0x48] ss:$36 sps:$4 sm:$0xff]   ;;  %v3974_v58 = vld [vmem:[#allocation3 + $0x50] ss:$36 sps:$4 sm:$0xff]   ;;  %v3980_v0 = vld [vmem:[#allocation6 + $0x148] sm:$0xff]  }
  0x4a   :  { %v3975_v59 = vld [vmem:[#allocation6 + $0x198] sm:$0xff]   ;;  %v3981_v1 = vld [vmem:[#allocation6 + $0x108] sm:$0xff]   ;;  %v3984_v4 = vld [vmem:[#allocation6 + $0x140] sm:$0xff]  }
  0x4b   :  { %3242 = vmatpush3.bf16.msra.mxu0 %v3934_v22  ;;  %v3982_v2 = vld [vmem:[#allocation6 + $0x1c8] sm:$0xff]   ;;  %v3985_v5 = vld [vmem:[#allocation6 + $0x100] sm:$0xff]   ;;  %v3991_v10 = vld [vmem:[#allocation6 + $0x238] sm:$0xff]  }
  0x4c   :  { %3270 = vmatpush3.bf16.msra.mxu1 %v3935_v23  ;;  %3243 = vmatprep.subr.bf16.mxu0 %v3936_v24  ;;  %v3983_v3 = vld [vmem:[#allocation6 + $0x188] sm:$0xff]   ;;  %v3986_v6 = vld [vmem:[#allocation6 + $0x1c0] sm:$0xff]   ;;  %v3995_v13 = vld [vmem:[#allocation6 + $0x230] sm:$0xff]  }
  0x4d   :  { %3271 = vmatprep.subr.bf16.mxu1 %v3937_v25  ;;  %v3987_v7 = vld [vmem:[#allocation3 + $0x10] ss:$36 sps:$4 sm:$0xff]   ;;  %v3992_v11 = vld [vmem:[#allocation3 + $0x18] ss:$36 sps:$4 sm:$0xff]   ;;  %v4000_v17 = vld [vmem:[#allocation3 + $0x64] ss:$36 sps:$4 sm:$0xff]  }
  0x4e   :  { %v3989_v8 = vld [vmem:[#allocation3 + $0x14] ss:$36 sps:$4 sm:$0xff]   ;;  %v3996_v14 = vld [vmem:[#allocation3 + $0x5c] ss:$36 sps:$4 sm:$0xff]   ;;  %v4004_v20 = vld [vmem:[#allocation6 + $0x218] sm:$0xff]  }
  0x4f   :  { %3244 = vmatpush3.bf16.msra.mxu0 %v3938_v26  ;;  %v3990_v9 = vld [vmem:[#allocation6 + $0x180] sm:$0xff]   ;;  %v3998_v15 = vld [vmem:[#allocation3 + $0x58] ss:$36 sps:$4 sm:$0xff]   ;;  %v4002_v18 = vld [vmem:[#allocation3 + $0x60] ss:$36 sps:$4 sm:$0xff]  }
  0x50   :  { %3272 = vmatpush3.bf16.msra.mxu1 %v3939_v27  ;;  %3245 = vmatprep.subr.bf16.mxu0 %v3940_v28  ;;  %v3999_v16 = vld [vmem:[#allocation6 + $0x228] sm:$0xff]   ;;  %v4003_v19 = vld [vmem:[#allocation6 + $0x220] sm:$0xff]   ;;  %v4008_v21 = vld [vmem:[#allocation3 + $0x20] ss:$36 sps:$4 sm:$0xff]  }
  0x51   :  { %3273 = vmatprep.subr.bf16.mxu1 %v3941_v29  ;;  %v4005_v22 = vld [vmem:[#allocation6 + $0x210] sm:$0xff]   ;;  %v4006_v23 = vld [vmem:[#allocation6 + $0x208] sm:$0xff]   ;;  %v4007_v24 = vld [vmem:[#allocation6 + $0x200] sm:$0xff]  }
  0x52   :  { %v4009_v25 = vld [vmem:[#allocation3 + $0x68] ss:$36 sps:$4 sm:$0xff]   ;;  %vm1110_vm2 = vmor %vm1109_vm1, %vm1108_vm0 }
  0x53   :  { %3246 = vmatpush3.bf16.msra.mxu0 %v3942_v30  ;;  %vm1115_vm5 = vmor %vm1114_vm4, %vm1113_vm3  ;;  %vm1178_vm3 = vsmask.f32 4352  ;;  %vm1154_vm4 = vcmask 64512  }
  0x54   :  { %3274 = vmatpush3.bf16.msra.mxu1 %v3943_v31  ;;  %3287 = vmatprep.subr.bf16.mxu0 %v3950_v36  ;;  %vm1127_vm9 = vmor %vm1125_vm6, %vm1126_vm7 }
  0x55   :  { %3315 = vmatprep.subr.bf16.mxu1 %v3952_v38  ;;  %vm4420_vm15 = vmand %vm1161_vm10, %vm1162_vm11  ;;  %vm1608_vm11 = vsmask.f32 7424 }
  0x56   :  { %807 = vmatmul.mubr.bf16.vlgmr.msra.gmra.mxu0 %v3944_v32  ;;  %vm4424_vm0 = vmand %vm1164_vm12, %vm1165_vm13  ;;  %vm1486_vm13 = vcmask 916480  }
  0x57   :  { %856 = vmatmul.mubr.bf16.vlgmr.msra.gmra.mxu1 %v3947_v34  ;;  %3288 = vmatpush3.bf16.msra.mxu0 %v3951_v37  ;;  %vm4429_vm1 = vmand %vm1175_vm14, %vm1125_vm6 }
  0x58   :  { %3316 = vmatpush3.bf16.msra.mxu1 %v3953_v39  ;;  %3289 = vmatprep.subr.bf16.mxu0 %v3954_v40  ;;  %vm1167_vm7 = vmor %vm4424_vm0, %vm4420_vm15 }
  0x59   :  { %3317 = vmatprep.subr.bf16.mxu1 %v3956_v42  ;;  %814 = vmatprep.mubr.bf16.mxu0 %v3968_v54 }
  0x5a   :  { %863 = vmatprep.mubr.bf16.mxu1 %v3970_v55 }
  0x5b   :  { %3290 = vmatpush3.bf16.msra.mxu0 %v3955_v41 }
  0x5c   :  { %3318 = vmatpush3.bf16.msra.mxu1 %v3957_v43  ;;  %3291 = vmatprep.subr.bf16.mxu0 %v3958_v44 }
  0x5d   :  { %3319 = vmatprep.subr.bf16.mxu1 %v3960_v46 }
  0x5e   :  { %815 = vmatmul.mubr.bf16.gmra.mxu0 %v3973_v57 }
  0x5f   :  { %3292 = vmatpush3.bf16.msra.mxu0 %v3959_v45  ;;  %864 = vmatmul.mubr.bf16.gmra.mxu1 %v3974_v58 }
  0x60   :  { %3320 = vmatpush3.bf16.msra.mxu1 %v3961_v47  ;;  %3293 = vmatprep.subr.bf16.mxu0 %v3962_v48 }
  0x61   :  { %3321 = vmatprep.subr.bf16.mxu1 %v3964_v50  ;;  %904 = vmatprep.mubr.bf16.mxu0 %v3989_v8 }
  0x62   :  { %953 = vmatprep.mubr.bf16.mxu1 %v3994_v12 }
  0x63   :  { %3294 = vmatpush3.bf16.msra.mxu0 %v3963_v49 }
  0x64   :  { %3322 = vmatpush3.bf16.msra.mxu1 %v3965_v51  ;;  %3295 = vmatprep.subr.bf16.mxu0 %v3966_v52 }
  0x65   :  { %3323 = vmatprep.subr.bf16.mxu1 %v3972_v56 }
  0x67   :  { %3296 = vmatpush3.bf16.msra.mxu0 %v3967_v53 }
  0x68   :  { %3324 = vmatpush3.bf16.msra.mxu1 %v3975_v59  ;;  %3297 = vmatprep.subr.bf16.mxu0 %v3976_v60 }
  0x69   :  { %3325 = vmatprep.subr.bf16.mxu1 %v3978_v62 }
  0x6b   :  { %3298 = vmatpush3.bf16.msra.mxu0 %v3977_v61 }
  0x6c   :  { %3326 = vmatpush3.bf16.msra.mxu1 %v3979_v63  ;;  %3299 = vmatprep.subr.bf16.mxu0 %v3980_v0 }
  0x6d   :  { %3327 = vmatprep.subr.bf16.mxu1 %v3982_v2 }
  0x6f   :  { %3300 = vmatpush3.bf16.msra.mxu0 %v3981_v1 }
  0x70   :  { %3328 = vmatpush3.bf16.msra.mxu1 %v3983_v3  ;;  %3301 = vmatprep.subr.bf16.mxu0 %v3984_v4 }
  0x71   :  { %3329 = vmatprep.subr.bf16.mxu1 %v3986_v6 }
  0x73   :  { %3302 = vmatpush3.bf16.msra.mxu0 %v3985_v5 }
  0x74   :  { %3330 = vmatpush3.bf16.msra.mxu1 %v3990_v9  ;;  %3515 = vmatprep.subr.bf16.mxu0 %v3991_v10 }
  0x76   :  { %905 = vmatmul.mubr.bf16.vlgmr.msra.gmra.mxu0 %v3987_v7 }
  0x77   :  { %3516 = vmatpush3.bf16.msra.mxu0 %v3991_v10  ;;  %954 = vmatmul.mubr.bf16.vlgmr.msra.gmra.mxu1 %v3992_v11 }
  0x78   :  { %3517 = vmatprep.subr.bf16.mxu0 %v3995_v13  ;;  %912 = vmatprep.mubr.bf16.mxu0 %v3996_v14 }
  0x79   :  { %961 = vmatprep.mubr.bf16.mxu1 %v4000_v17 }
  0x7b   :  { %3518 = vmatpush3.bf16.msra.mxu0 %v3995_v13 }
  0x7c   :  { %3519 = vmatprep.subr.bf16.mxu0 %v3999_v16 }
  0x7e   :  { %913 = vmatmul.mubr.bf16.gmra.mxu0 %v3998_v15 }
  0x7f   :  { %3520 = vmatpush3.bf16.msra.mxu0 %v3999_v16  ;;  %962 = vmatmul.mubr.bf16.gmra.mxu1 %v4002_v18 }
  0x80   :  { %3521 = vmatprep.subr.bf16.mxu0 %v4003_v19  ;;  %3531 = vmatprep.mubr.bf16.mxu0 %v4008_v21 }
  0x83   :  { %3522 = vmatpush3.bf16.msra.mxu0 %v4003_v19 }
  0x84   :  { %3523 = vmatprep.subr.bf16.mxu0 %v4004_v20 }
  0x87   :  { %3524 = vmatpush3.bf16.msra.mxu0 %v4004_v20 }
  0x88   :  { %3525 = vmatprep.subr.bf16.mxu0 %v4005_v22 }
  0x8b   :  { %3526 = vmatpush3.bf16.msra.mxu0 %v4005_v22 }
  0x8c   :  { %3527 = vmatprep.subr.bf16.mxu0 %v4006_v23 }
  0x8f   :  { %3528 = vmatpush3.bf16.msra.mxu0 %v4006_v23 }
  0x90   :  { %3529 = vmatprep.subr.bf16.mxu0 %v4007_v24 }
  0x93   :  { %3530 = vmatpush3.bf16.msra.mxu0 %v4007_v24 }
  0x96   :  { %3532 = vmatmul.mubr.bf16.vlgmr.msra.gmra.mxu0 %v4009_v25 }
 0x116   :  { %v3247_v26 = vpop.f32.mrf.mxu0 }
 0x117   :  { %v3275_v27 = vpop.f32.mrf.mxu1 }
 0x118   :  { %v3248_v28 = vpop.f32.mrf.mxu0 }
 0x119   :  { %v3276_v29 = vpop.f32.mrf.mxu1  ;;  %v3249_v53 = vadd.f32 %v3248_v28, %v3247_v26 }
 0x11a   :  { %v3250_v30 = vpop.f32.mrf.mxu0  ;;  %v3277_v54 = vadd.f32 %v3276_v29, %v3275_v27 }
 0x11b   :  { %v3278_v31 = vpop.f32.mrf.mxu1 }
 0x11c   :  { %v3251_v32 = vpop.f32.mrf.mxu0  ;;  %v858_v63 = vadd.f32 %v3277_v54, %v3249_v53 }
 0x11d   :  { %v3279_v34 = vpop.f32.mrf.mxu1  ;;  %v3252_v57 = vadd.f32 %v3251_v32, %v3250_v30 }
 0x11e   :  { %v3253_v33 = vpop.f32.mrf.mxu0  ;;  %v3280_v58 = vadd.f32 %v3279_v34, %v3278_v31 }
 0x11f   :  { %v3281_v35 = vpop.f32.mrf.mxu1 }
 0x120   :  { %v3254_v36 = vpop.f32.mrf.mxu0  ;;  %v861_v2 = vadd.f32 %v3280_v58, %v3252_v57 }
 0x121   :  { %v3282_v37 = vpop.f32.mrf.mxu1  ;;  %v3255_v59 = vadd.f32 %v3254_v36, %v3253_v33 }
 0x122   :  { %v3256_v38 = vpop.f32.mrf.mxu0  ;;  %v3283_v60 = vadd.f32 %v3282_v37, %v3281_v35 }
 0x123   :  { %v3284_v39 = vpop.f32.mrf.mxu1 }
 0x124   :  { %v3257_v40 = vpop.f32.mrf.mxu0  ;;  %v866_v6 = vadd.f32 %v3283_v60, %v3255_v59 }
 0x125   :  { %v3285_v42 = vpop.f32.mrf.mxu1  ;;  %v3258_v3 = vadd.f32 %v3257_v40, %v3256_v38 }
 0x126   :  { %v3286_v4 = vadd.f32 %v3285_v42, %v3284_v39 }
 0x128   :  { %v869_v15 = vadd.f32 %v3286_v4, %v3258_v3 }
 0x136   :  { %v3303_v41 = vpop.f32.mrf.mxu0 }
 0x137   :  { %v3331_v44 = vpop.f32.mrf.mxu1 }
 0x138   :  { %v3304_v43 = vpop.f32.mrf.mxu0 }
 0x139   :  { %v3332_v46 = vpop.f32.mrf.mxu1  ;;  %v3305_v61 = vadd.f32 %v3304_v43, %v3303_v41 }
 0x13a   :  { %v3306_v45 = vpop.f32.mrf.mxu0  ;;  %v3333_v9 = vadd.f32 %v3332_v46, %v3331_v44 }
 0x13b   :  { %v3334_v48 = vpop.f32.mrf.mxu1  ;;  %v907_v7 = vadd.f32 %v3305_v61, %v858_v63 }
 0x13c   :  { %v3307_v47 = vpop.f32.mrf.mxu0 }
 0x13d   :  { %v3335_v50 = vpop.f32.mrf.mxu1  ;;  %v3308_v62 = vadd.f32 %v3307_v47, %v3306_v45  ;;  %v956_v21 = vadd.f32 %v3333_v9, %v907_v7  ;;  %v1043_v45 = vlaneseq }
 0x13e   :  { %v3309_v49 = vpop.f32.mrf.mxu0  ;;  %v3336_v11 = vadd.f32 %v3335_v50, %v3334_v48 }
 0x13f   :  { %v3337_v52 = vpop.f32.mrf.mxu1  ;;  %v910_v10 = vadd.f32 %v3308_v62, %v861_v2  ;;  %v1044_v46 = vshrl.u32 %v1043_v45, 7 }
 0x140   :  { %v3310_v51 = vpop.f32.mrf.mxu0 }
 0x141   :  { %v3338_v56 = vpop.f32.mrf.mxu1  ;;  %v3311_v5 = vadd.f32 %v3310_v51, %v3309_v49  ;;  %v959_v22 = vadd.f32 %v3336_v11, %v910_v10  ;;  %v4308_v48 = vsub.s32 0, %v1044_v46  ;;  %v4322_v11 = vld [vmem:[#allocation8 + $0x38] sm:$0xff]  }
 0x142   :  { %v3312_v55 = vpop.f32.mrf.mxu0  ;;  %v3339_v17 = vadd.f32 %v3338_v56, %v3337_v52 }
 0x143   :  { %v3340_v1 = vpop.f32.mrf.mxu1  ;;  %v915_v16 = vadd.f32 %v3311_v5, %v866_v6  ;;  %5056 = vst [vmem:[#allocation16_spill] sm:$0xff] %v4308_v48 }
 0x144   :  { %v3313_v0 = vpop.f32.mrf.mxu0 }
 0x145   :  { %v3314_v12 = vadd.f32 %v3313_v0, %v3312_v55  ;;  %v3341_v13 = vpop.f32.mrf.mxu1  ;;  %v964_v24 = vadd.f32 %v3339_v17, %v915_v16  ;;  %v4335_v16 = vld [vmem:[#allocation8 + $0x20] sm:$0xff]   ;;  %v4339_v17 = vld [vmem:[#allocation8 + $0x18] sm:$0xff]  }
 0x146   :  { %v3342_v20 = vadd.f32 %v3341_v13, %v3340_v1  ;;  %v4327_v13 = vld [vmem:[#allocation8 + $0x30] sm:$0xff]  }
 0x147   :  { %v918_v19 = vadd.f32 %v3314_v12, %v869_v15  ;;  %v4220_v12 = vmov 0.0   ;;  %v4331_v15 = vld [vmem:[#allocation8 + $0x28] sm:$0xff]  }
 0x148   :  { %3555 = vmatprep.subr.bf16.mxu0 %v4220_v12  ;;  %3535 = vmatprep.subr.bf16.mxu1 %v4220_v12 }
 0x149   :  { %v967_v28 = vadd.f32 %v3342_v20, %v918_v19  ;;  %3556 = vmatpush3.bf16.msra.mxu0 %v4322_v11  ;;  %3571 = vmatprep.mubr.msk.bf16.mxu0 %vm4222_vm8, %v4220_v12 }
 0x14a   :  { %3557 = vmatprep.subr.bf16.mxu0 %v4220_v12  ;;  %3551 = vmatprep.mubr.msk.bf16.mxu1 %vm4222_vm8, %v4220_v12 }
 0x14d   :  { %3558 = vmatpush3.bf16.msra.mxu0 %v4327_v13 }
 0x14e   :  { %3559 = vmatprep.subr.bf16.mxu0 %v4220_v12 }
 0x151   :  { %3560 = vmatpush3.bf16.msra.mxu0 %v4331_v15 }
 0x152   :  { %3561 = vmatprep.subr.bf16.mxu0 %v4220_v12 }
 0x155   :  { %3562 = vmatpush3.bf16.msra.mxu0 %v4335_v16 }
 0x156   :  { %v3533_v8 = vpop.f32.mrf.mxu0  ;;  %3563 = vmatprep.subr.bf16.mxu0 %v4220_v12 }
 0x157   :  { %v4296_v27 = vadd.f32 %v3533_v8, %v964_v24 }
 0x158   :  { %v1004_v14 = vpop.f32.mrf.mxu0 }
 0x159   :  { %v4292_v25 = vadd.f32 %v1004_v14, %v956_v21  ;;  %v4221_v14 = vmov 0   ;;  %3564 = vmatpush3.bf16.msra.mxu0 %v4339_v17 }
 0x15a   :  { %v3534_v18 = vpop.f32.mrf.mxu0  ;;  %1111 = vst.msk [vmem:[#allocation2] sm:$0xff] %vm1110_vm2, %v4221_v14  ;;  %1112 = vst.msk [vmem:[#allocation2 + $0x8] sm:$0xff] %vm1110_vm2, %v4221_v14  ;;  %3565 = vmatprep.subr.bf16.mxu0 %v4220_v12 }
 0x15b   :  { %v4300_v30 = vadd.f32 %v3534_v18, %v967_v28  ;;  %1117 = vst.msk [vmem:[#allocation2 + $0x18] sm:$0xff] %vm1110_vm2, %v4221_v14  ;;  %1118 = vst.msk [vmem:[#allocation2 + $0x20] sm:$0xff] %vm1110_vm2, %v4221_v14  ;;  %v1020_v28 = vld [vmem:[%s5038_s3] sm:$0x1]  ;;  %vm1177_vm2 = vcmask 61444   ;;  %s4224_s3 = smov 112  }
 0x15c   :  { %v1007_v23 = vpop.f32.mrf.mxu0  ;;  %1116 = vst.msk [vmem:[#allocation2 + $0x10] sm:$0x11] %vm1115_vm5, %v4221_v14  ;;  %1119 = vst.msk [vmem:[#allocation2 + $0x28] sm:$0x11] %vm1115_vm5, %v4221_v14  ;;  %v4411_v14 = vld [vmem:[#allocation8 + $0x48] sm:$0xff]  }
 0x15d   :  { %v4294_v26 = vadd.f32 %v1007_v23, %v959_v22  ;;  %v1019_v22 = vld [vmem:[%s5037_s2] sm:$0x1]  ;;  %vm4433_vm5 = vmor %vm1164_vm12, %vm1161_vm10  ;;  %s4223_s2 = smov 120   ;;  %vm2002_vm10 = vcmask 1046528   ;;  %vm1278_vm12 = vcmask 982016  }
 0x15e   :  { %vm4441_vm6 = vmand %vm1177_vm2, %vm1178_vm3 }
 0x15f   :  { %v1021_v29 = vadd.f32 %v4294_v26, %v4292_v25 }
 0x161   :  { %v1022_v31 = vadd.f32 %v1021_v29, %v4296_v27 }
 0x163   :  { %v1023_v32 = vadd.f32 %v1022_v31, %v4300_v30 }
 0x165   :  { %v1024_v33 = vrot.slane %v1023_v32, 4 }
 0x167   :  { %v1025_v34 = vadd.f32 %v1024_v33, %v1023_v32 }
 0x169   :  { %v1026_v35 = vrot.slane %v1025_v34, 2 }
 0x16b   :  { %v1027_v36 = vadd.f32 %v1026_v35, %v1025_v34 }
 0x16d   :  { %v1028_v37 = vrot.slane %v1027_v36, 1 }
 0x16f   :  { %v1029_v38 = vadd.f32 %v1028_v37, %v1027_v36  ;;  %v4355_v36 = vld [vmem:[#allocation8 + $0x10] sm:$0xff]  }
 0x170   :  { %3566 = vmatpush3.bf16.msra.mxu0 %v4355_v36 }
 0x171   :  { %1030 = vrot.lane.b32.xlu0 %v1029_v38, %s4217_s4  ;;  %3567 = vmatprep.subr.bf16.mxu0 %v4220_v12 }
 0x1e3   :  { %v1031_v39 = vpop.permute.xlu0 %1030 }
 0x1e4   :  { %v1032_v40 = vadd.f32 %v1031_v39, %v1029_v38 }
 0x1e6   :  { %1033 = vrot.lane.b32.xlu0 %v1032_v40, %s4218_s7 }
 0x258   :  { %v1034_v41 = vpop.permute.xlu0 %1033 }
 0x259   :  { %v1035_v42 = vadd.f32 %v1034_v41, %v1032_v40 }
 0x25b   :  { %1036 = vrot.lane.b32.xlu1 %v1035_v42, %s4219_s27 }
 0x2cd   :  { %v1037_v43 = vpop.permute.xlu1 %1036 }
 0x2ce   :  { %v1038_v44 = vadd.f32 %v1037_v43, %v1035_v42 }
 0x2d0   :  { %1039 = vrot.lane.b32.xlu1 %v1038_v44, %s4210_s30 }
 0x342   :  { %v1040_v47 = vpop.permute.xlu1 %1039 }
 0x343   :  { %v1041_v49 = vadd.f32 %v1040_v47, %v1038_v44 }
 0x345   :  { %v4310_v50 = vmul.f32 0.001953125, %v1041_v49 }
 0x347   :  { %v1046_v51 = vrot.slane %v4310_v50, %v4308_v48 }
 0x349   :  { %v1047_v52 = vsub.f32 %v4292_v25, %v1046_v51  ;;  %v1048_v53 = vsub.f32 %v4294_v26, %v1046_v51  ;;  %v1049_v54 = vsub.f32 %v4296_v27, %v1046_v51  ;;  %v1050_v55 = vsub.f32 %v4300_v30, %v1046_v51  ;;  %v4367_v51 = vld [vmem:[#allocation8] sm:$0xff]  }
 0x34b   :  { %v1051_v56 = vmul.f32 %v1047_v52, %v1047_v52  ;;  %v1052_v57 = vmul.f32 %v1048_v53, %v1048_v53  ;;  %v1053_v58 = vmul.f32 %v1049_v54, %v1049_v54  ;;  %v1054_v60 = vmul.f32 %v1050_v55, %v1050_v55 }
 0x34d   :  { %v1055_v59 = vadd.f32 %v1052_v57, %v1051_v56 }
 0x34f   :  { %v1056_v61 = vadd.f32 %v1055_v59, %v1053_v58 }
 0x351   :  { %v1057_v62 = vadd.f32 %v1056_v61, %v1054_v60 }
 0x353   :  { %v1058_v63 = vrot.slane %v1057_v62, 4 }
 0x355   :  { %v1059_v0 = vadd.f32 %v1058_v63, %v1057_v62 }
 0x357   :  { %v1060_v1 = vrot.slane %v1059_v0, 2 }
 0x359   :  { %v1061_v2 = vadd.f32 %v1060_v1, %v1059_v0 }
 0x35b   :  { %v1062_v3 = vrot.slane %v1061_v2, 1 }
 0x35d   :  { %v1063_v4 = vadd.f32 %v1062_v3, %v1061_v2 }
 0x35f   :  { %1064 = vrot.lane.b32.xlu0 %v1063_v4, %s4217_s4 }
 0x3d1   :  { %v1065_v5 = vpop.permute.xlu0 %1064 }
 0x3d2   :  { %v1066_v6 = vadd.f32 %v1065_v5, %v1063_v4  ;;  %v4388_v5 = vld [vmem:[#allocation8 + $0x78] sm:$0xff]  }
 0x3d3   :  { %3536 = vmatpush3.bf16.msra.mxu1 %v4388_v5 }
 0x3d4   :  { %1067 = vrot.lane.b32.xlu1 %v1066_v6, %s4218_s7  ;;  %3537 = vmatprep.subr.bf16.mxu1 %v4220_v12 }
 0x446   :  { %v1068_v7 = vpop.permute.xlu1 %1067 }
 0x447   :  { %v1069_v8 = vadd.f32 %v1068_v7, %v1066_v6  ;;  %v4391_v6 = vld [vmem:[#allocation8 + $0x70] sm:$0xff]   ;;  %v4395_v7 = vld [vmem:[#allocation8 + $0x68] sm:$0xff]  }
 0x448   :  { %3538 = vmatpush3.bf16.msra.mxu1 %v4391_v6 }
 0x449   :  { %1070 = vrot.lane.b32.xlu0 %v1069_v8, %s4219_s27  ;;  %3539 = vmatprep.subr.bf16.mxu1 %v4220_v12 }
 0x44c   :  { %3540 = vmatpush3.bf16.msra.mxu1 %v4395_v7 }
 0x44d   :  { %3541 = vmatprep.subr.bf16.mxu1 %v4220_v12 }
 0x4bb   :  { %v1071_v9 = vpop.permute.xlu0 %1070 }
 0x4bc   :  { %v1072_v10 = vadd.f32 %v1071_v9, %v1069_v8  ;;  %v4399_v8 = vld [vmem:[#allocation8 + $0x60] sm:$0xff]   ;;  %v4403_v9 = vld [vmem:[#allocation8 + $0x58] sm:$0xff]  }
 0x4bd   :  { %3542 = vmatpush3.bf16.msra.mxu1 %v4399_v8 }
 0x4be   :  { %1073 = vrot.lane.b32.xlu1 %v1072_v10, %s4210_s30  ;;  %3543 = vmatprep.subr.bf16.mxu1 %v4220_v12 }
 0x4c1   :  { %3544 = vmatpush3.bf16.msra.mxu1 %v4403_v9 }
 0x4c2   :  { %3545 = vmatprep.subr.bf16.mxu1 %v4220_v12 }
 0x530   :  { %v1074_v18 = vpop.permute.xlu1 %1073 }
 0x531   :  { %v1075_v19 = vadd.f32 %v1074_v18, %v1072_v10  ;;  %v4407_v10 = vld [vmem:[#allocation8 + $0x50] sm:$0xff]   ;;  %v4415_v18 = vld [vmem:[#allocation8 + $0x40] sm:$0xff]  }
 0x532   :  { %3546 = vmatpush3.bf16.msra.mxu1 %v4407_v10 }
 0x533   :  { %v1076_v20 = vmul.f32 0.001953125, %v1075_v19  ;;  %3547 = vmatprep.subr.bf16.mxu1 %v4220_v12 }
 0x535   :  { %v1077_v21 = vadd.f32 1e-05, %v1076_v20 }
 0x536   :  { %3548 = vmatpush3.bf16.msra.mxu1 %v4411_v14 }
 0x537   :  { %4097 = vrsqrt.f32 %v1077_v21  ;;  %3549 = vmatprep.subr.bf16.mxu1 %v4220_v12 }
 0x53a   :  { %3550 = vmatpush3.bf16.msra.mxu1 %v4415_v18 }
 0x53b   :  { %3575 = vmatprep.subr.bf16.mxu1 %v4220_v12 }
 0x544   :  { %v4098_v23 = vpop.eup %4097 }
 0x545   :  { %v1079_v24 = vmul.f32 %v4098_v23, %v1019_v22 }
 0x547   :  { %v1080_v29 = vmul.f32 %v1079_v24, %v4310_v50  ;;  %v1086_v31 = vrot.slane %v1079_v24, %v4308_v48  ;;  %v1168_v24 = vld [vmem:[#allocation2] sm:$0xff] }
 0x549   :  { %v1081_v32 = vsub.f32 %v1020_v28, %v1080_v29  ;;  %v1088_v33 = vmul.f32 %v1086_v31, %v4292_v25  ;;  %v1089_v35 = vmul.f32 %v1086_v31, %v4294_v26  ;;  %v1090_v37 = vmul.f32 %v1086_v31, %v4296_v27  ;;  %v4361_v26 = vld [vmem:[#allocation8 + $0x8] sm:$0xff]  }
 0x54a   :  { %v1091_v38 = vmul.f32 %v1086_v31, %v4300_v30  ;;  %3568 = vmatpush3.bf16.msra.mxu0 %v4361_v26 }
 0x54b   :  { %v1096_v34 = vrot.slane %v1081_v32, %v4308_v48  ;;  %3569 = vmatprep.subr.bf16.mxu0 %v4220_v12 }
 0x54d   :  { %v1098_v39 = vadd.f32 %v1096_v34, %v1088_v33  ;;  %v1099_v40 = vadd.f32 %v1096_v34, %v1089_v35  ;;  %v1100_v41 = vadd.f32 %v1096_v34, %v1090_v37  ;;  %v1101_v25 = vadd.f32 %v1096_v34, %v1091_v38  ;;  %v1181_v38 = vld [vmem:[#allocation2 + $0x10] sm:$0x11] }
 0x54e   :  { %3570 = vmatpush3.bf16.msra.mxu0 %v4367_v51 }
 0x54f   :  { %v1102_v42 = vmax.f32 %v1098_v39, 0.0  ;;  %v1103_v43 = vmax.f32 %v1099_v40, 0.0  ;;  %v1104_v44 = vmax.f32 %v1100_v41, 0.0  ;;  %v1105_v45 = vmax.f32 %v1101_v25, 0.0  ;;  %3595 = vmatprep.subr.bf16.mxu0 %v4220_v12 }
 0x551   :  { %v3203_v46 = vpack.c.bf16 %v1102_v42, %v1102_v42  ;;  %v3204_v27 = vpack.c.bf16 %v1103_v43, %v1103_v43  ;;  %v4364_v30 = vpack.c.bf16 %v1104_v44, %v1104_v44  ;;  %v3206_v47 = vpack.c.bf16 %v1105_v45, %v1105_v45  ;;  %v4468_v45 = vld [vmem:[#allocation8 + $0xf8] sm:$0xff]  }
 0x553   :  { %v1129_v49 = vshrl.u32 %v3203_v46, 16  ;;  %v1137_v50 = vshrl.u32 %v3204_v27, 16  ;;  %v1190_v52 = vshrl.u32 %v4364_v30, 16  ;;  %v1198_v53 = vshrl.u32 %v3206_v47, 16 }
 0x554   :  { %v1132_v55 = vshll.u32 %v3203_v46, 16  ;;  %v1140_v57 = vshll.u32 %v3204_v27, 16  ;;  %v1201_v60 = vshll.u32 %v3206_v47, 16 }
 0x555   :  { %v1131_v54 = vrot.slane %v1129_v49, 7  ;;  %v1139_v56 = vrot.slane %v1137_v50, 7  ;;  %v4376_v58 = vrot.slane %v1190_v52, 7  ;;  %v4378_v59 = vrot.slane %v1198_v53, 7  ;;  %v4473_v49 = vld [vmem:[#allocation8 + $0xf0] sm:$0xff]  }
 0x557   :  { %v1134_v61 = vor.u32 %v1132_v55, %v1131_v54  ;;  %v1135_v62 = vrot.slane %v1131_v54, 4  ;;  %v1142_v63 = vor.u32 %v1140_v57, %v1139_v56  ;;  %v1196_v0 = vrot.slane %v4376_v58, 4 }
 0x558   :  { %v1203_v1 = vor.u32 %v1201_v60, %v4378_v59  ;;  %v1144_v4 = vrot.slane %v1139_v56, 4  ;;  %v1193_v56 = vshll.u32 %v4364_v30, 16 }
 0x559   :  { %1145 = vrot.lane.b32.xlu0 %v1134_v61, %s4217_s4  ;;  %v1143_v2 = vsel %vm1127_vm9, %v1135_v62, %v1142_v63 }
 0x55a   :  { %1147 = vrot.lane.b32.xlu1 %v1143_v2, %s4217_s4  ;;  %v4385_v3 = vsel %vm1127_vm9, %v1196_v0, %v1203_v1  ;;  %vm1180_vm9 = vmor %vm4441_vm6, %vm4429_vm1  ;;  %v1195_v63 = vor.u32 %v1193_v56, %v4376_v58  ;;  %v4485_v0 = vld [vmem:[#allocation8 + $0xe8] sm:$0xff]  }
 0x55d   :  { %1149 = vrot.lane.b32.xlu0 %v1144_v4, %s4217_s4 }
 0x5cb   :  { %v1146_v23 = vpop.permute.xlu0 %1145 }
 0x5cc   :  { %v1151_v28 = vrot.slane %v1146_v23, 4  ;;  %v1148_v29 = vpop.permute.xlu1 %1147 }
 0x5cd   :  { %v1152_v31 = vrot.slane %v1148_v29, 4 }
 0x5ce   :  { %v1155_v33 = vsel %vm1154_vm4, %v1151_v28, %v1146_v23 }
 0x5cf   :  { %v1169_v34 = vsel %vm1167_vm7, %v1155_v33, %v1168_v24  ;;  %v1156_v35 = vsel %vm1154_vm4, %v1152_v31, %v1148_v29  ;;  %v1150_v37 = vpop.permute.xlu0 %1149  ;;  %v4493_v31 = vld [vmem:[#allocation8 + $0xe0] sm:$0xff]  }
 0x5d0   :  { %1170 = vst [vmem:[#allocation2] sm:$0xff] %v1169_v34  ;;  %1174 = vst.msk [vmem:[#allocation2 + $0x8] sm:$0xff] %vm4433_vm5, %v1156_v35  ;;  %v1153_v39 = vrot.slane %v1150_v37, 4 }
 0x5d2   :  { %v1157_v40 = vsel %vm1154_vm4, %v1153_v39, %v1150_v37 }
 0x5d3   :  { %v1182_v41 = vsel %vm1180_vm9, %v1157_v40, %v1181_v38  ;;  %v4506_v40 = vld [vmem:[#allocation8 + $0xd8] sm:$0xff]  }
 0x5d4   :  { %1183 = vst [vmem:[#allocation2 + $0x10] sm:$0x11] %v1182_v41 }
 0x5d7   :  { %v4464_v25 = vld [vmem:[#allocation2 + $0x8] sm:$0xff]  ;;  %v1981_v55 = vld [vmem:[#allocation2] sm:$0xe] }
 0x5d8   :  { %v3104_v42 = vcombine.high %v1169_v34, %v4464_v25  ;;  %v3103_v43 = vcombine.low %v1169_v34, %v4464_v25  ;;  %v4018_v44 = vld [vmem:[#allocation2] ss:$8 sps:$4 sm:$0xff]  }
 0x5d9   :  { %3572 = vmatmul.mubr.bf16.vlgmr.msra.gmra.mxu0 %v4018_v44  ;;  %v1581_v54 = vld [vmem:[#allocation2 + $0x8] sm:$0xf]  ;;  %v2098_v33 = vld [vmem:[#allocation2] sm:$0xee] }
 0x5da   :  { %1276 = vrot.lane.b32.xlu0 %v3104_v42, %s4223_s2  ;;  %1274 = vrot.lane.b32.xlu1 %v3103_v43, %s4223_s2  ;;  %v1761_v27 = vshll.u32 %v3104_v42, 16  ;;  %v1749_v47 = vshll.u32 %v3103_v43, 16  ;;  %v3160_v1 = vcombine.low %v1981_v55, %v1581_v54  ;;  %v1759_v4 = vshrl.u32 %v3104_v42, 16  ;;  %v1580_v39 = vld [vmem:[#allocation2] sm:$0xf] }
 0x5db   :  { %v1715_v46 = vld [vmem:[#allocation2 + $0x10] sm:$0x11]  ;;  %3596 = vmatpush3.bf16.msra.mxu0 %v4468_v45  ;;  %3611 = vmatprep.mubr.msk.bf16.mxu0 %vm4222_vm8, %v4220_v12  ;;  %v1747_v24 = vshrl.u32 %v3103_v43, 16  ;;  %v3170_v37 = vcombine.high %v2098_v33, %v4464_v25  ;;  %v3169_v38 = vcombine.low %v2098_v33, %v4464_v25 }
 0x5dc   :  { %v3143_v50 = vcombine.high %v1715_v46, %v1715_v46  ;;  %v3142_v52 = vcombine.low %v1715_v46, %v1715_v46  ;;  %v4477_v53 = vld [vmem:[#allocation2 + $0x10] ss:$0 sps:$4 sm:$0x11]   ;;  %3597 = vmatprep.subr.bf16.mxu0 %v4220_v12  ;;  %v1763_v61 = vrot.slane %v1761_v27, 1  ;;  %v1751_v62 = vrot.slane %v1749_v47, 1 }
 0x5dd   :  { %v2004_v2 = vrot.slane %v4477_v53, 1  ;;  %v2003_v28 = vrot.slane %v3160_v1, 1  ;;  %v2124_v44 = vrot.slane %v3170_v37, 1  ;;  %v2121_v46 = vrot.slane %v3169_v38, 1  ;;  %v4512_v27 = vld [vmem:[#allocation8 + $0xd0] sm:$0xff]   ;;  %v4544_v1 = vld [vmem:[#allocation8 + $0x168] sm:$0xff]  }
 0x5de   :  { %1484 = vrot.lane.b32.xlu0 %v3104_v42, %s4224_s3  ;;  %1482 = vrot.lane.b32.xlu1 %v3103_v43, %s4224_s3  ;;  %v1766_v57 = vshll.u32 %v3143_v50, 16  ;;  %v1754_v60 = vshll.u32 %v3142_v52, 16  ;;  %v1764_v58 = vor.u32 %v1763_v61, %v1759_v4  ;;  %v1752_v29 = vor.u32 %v1751_v62, %v1747_v24  ;;  %v4533_v62 = vld [vmem:[#allocation8 + $0x178] sm:$0xff]   ;;  %v4560_v24 = vld [vmem:[#allocation8 + $0x148] sm:$0xff]  }
 0x5df   :  { %3598 = vmatpush3.bf16.msra.mxu0 %v4473_v49  ;;  %v4496_v34 = vsel %vm2002_vm10, %v2003_v28, %v2004_v2  ;;  %v2125_v41 = vrot.slane %v3143_v50, 1  ;;  %v2122_v42 = vrot.slane %v3142_v52, 1  ;;  %v3130_v43 = vcombine.low %v1580_v39, %v1581_v54  ;;  %v4520_v52 = vld [vmem:[#allocation8 + $0xc8] sm:$0xff]   ;;  %v4548_v2 = vld [vmem:[#allocation8 + $0x160] sm:$0xff]   ;;  %v4552_v4 = vld [vmem:[#allocation8 + $0x158] sm:$0xff]   ;;  %5068 = vst [vmem:[#allocation18_spill] sm:$0xff] %v4560_v24 }
 0x5e0   :  { %3599 = vmatprep.subr.bf16.mxu0 %v4220_v12  ;;  %v1768_v23 = vrot.slane %v1766_v57, 1  ;;  %v1756_v30 = vrot.slane %v1754_v60, 1  ;;  %v1205_v54 = vrot.slane %v4378_v59, 4  ;;  %v1617_v56 = vshll.u32 %v4477_v53, 16  ;;  %v4528_v57 = vld [vmem:[#allocation8 + $0xc0] sm:$0xff]   ;;  %v4538_v53 = vld [vmem:[#allocation8 + $0x170] sm:$0xff]  }
 0x5e1   :  { %v2126_v25 = vsel %vm2002_vm10, %v2124_v44, %v2125_v41  ;;  %v2123_v47 = vsel %vm2002_vm10, %v2121_v46, %v2122_v42  ;;  %v1612_v50 = vshll.u32 %v3130_v43, 16  ;;  %v1610_v60 = vshrl.u32 %v3130_v43, 16  ;;  %v4569_v28 = vld [vmem:[#allocation8 + $0xb8] sm:$0xff]   ;;  %v4583_v38 = vld [vmem:[#allocation8 + $0xa8] sm:$0xff]  }
 0x5e2   :  { %1208 = vrot.lane.b32.xlu0 %v4385_v3, %s4217_s4  ;;  %1206 = vrot.lane.b32.xlu1 %v1195_v63, %s4217_s4  ;;  %v1769_v35 = vsel %vm1608_vm11, %v1764_v58, %v1768_v23  ;;  %v1757_v3 = vsel %vm1608_vm11, %v1752_v29, %v1756_v30  ;;  %v1619_v59 = vrot.slane %v1617_v56, 1  ;;  %v4556_v23 = vld [vmem:[#allocation8 + $0x150] sm:$0xff]   ;;  %v4564_v30 = vld [vmem:[#allocation8 + $0x140] sm:$0xff]   ;;  %v1222_v42 = vld [vmem:[#allocation2 + $0x18] sm:$0xff] }
 0x5e3   :  { %3600 = vmatpush3.bf16.msra.mxu0 %v4485_v0  ;;  %v1614_v55 = vrot.slane %v1612_v50, 1  ;;  %5067 = vst [vmem:[#allocation17_spill] sm:$0xff] %v4556_v23  ;;  %5069 = vst [vmem:[#allocation19_spill] sm:$0xff] %v4564_v30  ;;  %v4604_v56 = vld [vmem:[#allocation8 + $0x98] sm:$0xff]  }
 0x5e4   :  { %3601 = vmatprep.subr.bf16.mxu0 %v4220_v12 }
 0x5e5   :  { %v1615_v61 = vor.u32 %v1614_v55, %v1610_v60  ;;  %v4606_v60 = vld [vmem:[#allocation8 + $0x1f8] sm:$0xff]  }
 0x5e6   :  { %1772 = vrot.lane.b32.xlu0 %v1769_v35, %s4223_s2  ;;  %1770 = vrot.lane.b32.xlu1 %v1757_v3, %s4223_s2  ;;  %5070 = vst [vmem:[#allocation20_spill] sm:$0xff] %v4606_v60 }
 0x5e7   :  { %3602 = vmatpush3.bf16.msra.mxu0 %v4493_v31  ;;  %v1620_v63 = vsel %vm1608_vm11, %v1615_v61, %v1619_v59  ;;  %v4610_v61 = vld [vmem:[#allocation8 + $0x90] sm:$0xff]  }
 0x5e8   :  { %3603 = vmatprep.subr.bf16.mxu0 %v4220_v12  ;;  %v4614_v59 = vld [vmem:[#allocation8 + $0x1f0] sm:$0xff]  }
 0x5e9   :  { %5071 = vst [vmem:[#allocation21_spill] sm:$0xff] %v4614_v59 }
 0x5ea   :  { %1886 = vrot.lane.b32.xlu0 %v1769_v35, %s4224_s3  ;;  %1884 = vrot.lane.b32.xlu1 %v1757_v3, %s4224_s3  ;;  %v4573_v35 = vld [vmem:[#allocation8 + $0xb0] sm:$0xff]  }
 0x5eb   :  { %3604 = vmatpush3.bf16.msra.mxu0 %v4506_v40 }
 0x5ec   :  { %3605 = vmatprep.subr.bf16.mxu0 %v4220_v12 }
 0x5ee   :  { %2129 = vrot.lane.b32.xlu0 %v2126_v25, %s4223_s2  ;;  %2127 = vrot.lane.b32.xlu1 %v2123_v47, %s4223_s2 }
 0x5ef   :  { %3606 = vmatpush3.bf16.msra.mxu0 %v4512_v27 }
 0x5f0   :  { %3607 = vmatprep.subr.bf16.mxu0 %v4220_v12 }
 0x5f2   :  { %2241 = vrot.lane.b32.xlu0 %v2123_v47, %s4224_s3  ;;  %1210 = vrot.lane.b32.xlu1 %v1205_v54, %s4217_s4  ;;  %v4589_v47 = vld [vmem:[#allocation8 + $0xa0] sm:$0xff]  }
 0x5f3   :  { %3608 = vmatpush3.bf16.msra.mxu0 %v4520_v52 }
 0x5f4   :  { %3609 = vmatprep.subr.bf16.mxu0 %v4220_v12 }
 0x5f6   :  { %2243 = vrot.lane.b32.xlu1 %v2126_v25, %s4224_s3 }
 0x5f7   :  { %3610 = vmatpush3.bf16.msra.mxu0 %v4528_v57 }
 0x5f8   :  { %3635 = vmatprep.subr.bf16.mxu0 %v4220_v12 }
 0x5fa   :  { %3612 = vmatmul.mubr.bf16.vlgmr.msra.gmra.mxu0 %v1620_v63 }
 0x5fb   :  { %3636 = vmatpush3.bf16.msra.mxu0 %v4533_v62  ;;  %3651 = vmatprep.mubr.msk.bf16.mxu0 %vm4222_vm8, %v4220_v12 }
 0x5fc   :  { %3637 = vmatprep.subr.bf16.mxu0 %v4220_v12 }
 0x5ff   :  { %3638 = vmatpush3.bf16.msra.mxu0 %v4538_v53 }
 0x600   :  { %3639 = vmatprep.subr.bf16.mxu0 %v4220_v12 }
 0x603   :  { %3640 = vmatpush3.bf16.msra.mxu0 %v4544_v1 }
 0x604   :  { %3641 = vmatprep.subr.bf16.mxu0 %v4220_v12 }
 0x607   :  { %3642 = vmatpush3.bf16.msra.mxu0 %v4548_v2 }
 0x608   :  { %3643 = vmatprep.subr.bf16.mxu0 %v4220_v12 }
 0x60b   :  { %3644 = vmatpush3.bf16.msra.mxu0 %v4552_v4 }
 0x60c   :  { %3645 = vmatprep.subr.bf16.mxu0 %v4220_v12 }
 0x60f   :  { %3646 = vmatpush3.bf16.msra.mxu0 %v4556_v23  ;;  %v4685_v23 = vld [vmem:[#allocation8 + $0x120] sm:$0xff]  }
 0x610   :  { %3647 = vmatprep.subr.bf16.mxu0 %v4220_v12 }
 0x613   :  { %3648 = vmatpush3.bf16.msra.mxu0 %v4560_v24 }
 0x614   :  { %3649 = vmatprep.subr.bf16.mxu0 %v4220_v12 }
 0x617   :  { %3650 = vmatpush3.bf16.msra.mxu0 %v4564_v30 }
 0x618   :  { %3675 = vmatprep.subr.bf16.mxu0 %v4220_v12 }
 0x64c   :  { %v1275_v58 = vpop.permute.xlu1 %1274  ;;  %v1277_v29 = vpop.permute.xlu0 %1276 }
 0x64d   :  { %v1279_v33 = vsel %vm1278_vm12, %v1275_v58, %v1277_v29 }
 0x64e   :  { %3552 = vmatmul.mubr.bf16.vlgmr.msra.gmra.mxu1 %v1279_v33 }
 0x64f   :  { %3576 = vmatpush3.bf16.msra.mxu1 %v4569_v28  ;;  %3591 = vmatprep.mubr.msk.bf16.mxu1 %vm4222_vm8, %v4220_v12 }
 0x650   :  { %v4577_v3 = vpop.permute.xlu1 %1482  ;;  %v4579_v37 = vpop.permute.xlu0 %1484  ;;  %3577 = vmatprep.subr.bf16.mxu1 %v4220_v12 }
 0x651   :  { %v1487_v21 = vsel %vm1486_vm13, %v4577_v3, %v4579_v37  ;;  %v4675_v37 = vld [vmem:[#allocation8 + $0x128] sm:$0xff]  }
 0x653   :  { %3578 = vmatpush3.bf16.msra.mxu1 %v4573_v35 }
 0x654   :  { %v1207_v39 = vpop.permute.xlu1 %1206  ;;  %v1209_v41 = vpop.permute.xlu0 %1208  ;;  %3579 = vmatprep.subr.bf16.mxu1 %v4220_v12 }
 0x655   :  { %v1212_v43 = vrot.slane %v1207_v39, 4  ;;  %v1213_v44 = vrot.slane %v1209_v41, 4 }
 0x657   :  { %v1215_v46 = vsel %vm1154_vm4, %v1212_v43, %v1207_v39  ;;  %v1216_v25 = vsel %vm1154_vm4, %v1213_v44, %v1209_v41  ;;  %3580 = vmatpush3.bf16.msra.mxu1 %v4583_v38  ;;  %v4630_v39 = vld [vmem:[#allocation8 + $0x88] sm:$0xff]  }
 0x658   :  { %v1223_v50 = vsel %vm1167_vm7, %v1215_v46, %v1222_v42  ;;  %1225 = vst.msk [vmem:[#allocation2 + $0x20] sm:$0xff] %vm4433_vm5, %v1216_v25  ;;  %v4598_v54 = vpop.permute.xlu1 %1770  ;;  %v4600_v55 = vpop.permute.xlu0 %1772  ;;  %3581 = vmatprep.subr.bf16.mxu1 %v4220_v12  ;;  %v4632_v41 = vld [vmem:[#allocation8 + $0x1e8] sm:$0xff]   ;;  %v4641_v25 = vld [vmem:[#allocation8 + $0x80] sm:$0xff]  }
 0x659   :  { %1224 = vst [vmem:[#allocation2 + $0x18] sm:$0xff] %v1223_v50  ;;  %5072 = vst [vmem:[#allocation22_spill] sm:$0xff] %v4632_v41  ;;  %v1226_v43 = vld [vmem:[#allocation2 + $0x28] sm:$0x11] }
 0x65b   :  { %3582 = vmatpush3.bf16.msra.mxu1 %v4589_v47 }
 0x65c   :  { %v1885_v19 = vpop.permute.xlu1 %1884  ;;  %v1887_v20 = vpop.permute.xlu0 %1886  ;;  %3583 = vmatprep.subr.bf16.mxu1 %v4220_v12 }
 0x65d   :  { %v1888_v22 = vsel %vm1486_vm13, %v1885_v19, %v1887_v20  ;;  %v4654_v20 = vld [vmem:[#allocation8 + $0x138] sm:$0xff]  }
 0x65e   :  { %3652 = vmatmul.mubr.bf16.vlgmr.msra.gmra.mxu0 %v1888_v22  ;;  %v4656_v22 = vld [vmem:[#allocation8 + $0x1d8] sm:$0xff]  }
 0x65f   :  { %3584 = vmatpush3.bf16.msra.mxu1 %v4604_v56  ;;  %3676 = vmatpush3.bf16.msra.mxu0 %v4606_v60  ;;  %v4616_v63 = vld [vmem:[#allocation2 + $0x20] sm:$0xff]  ;;  %5074 = vst [vmem:[#allocation24_spill] sm:$0xff] %v4656_v22 }
 0x660   :  { %v4618_v58 = vpop.permute.xlu1 %2127  ;;  %3585 = vmatprep.subr.bf16.mxu1 %v4220_v12  ;;  %3677 = vmatprep.subr.bf16.mxu0 %v4220_v12  ;;  %v3188_v29 = vcombine.high %v1223_v50, %v4616_v63  ;;  %v3187_v33 = vcombine.low %v1223_v50, %v4616_v63  ;;  %v4643_v50 = vld [vmem:[#allocation8 + $0x1e0] sm:$0xff]   ;;  %v2749_v24 = vld [vmem:[#allocation2 + $0x18] sm:$0xee] }
 0x661   :  { %3691 = vmatprep.mubr.msk.bf16.mxu0 %vm4222_vm8, %v4220_v12  ;;  %5073 = vst [vmem:[#allocation23_spill] sm:$0xff] %v4643_v50 }
 0x662   :  { %2352 = vrot.lane.b32.xlu1 %v3188_v29, %s4223_s2  ;;  %2350 = vrot.lane.b32.xlu0 %v3187_v33, %s4223_s2  ;;  %v2591_v32 = vshll.u32 %v3188_v29, 16 }
 0x663   :  { %3586 = vmatpush3.bf16.msra.mxu1 %v4610_v61  ;;  %3678 = vmatpush3.bf16.msra.mxu0 %v4614_v59  ;;  %v2577_v59 = vshrl.u32 %v3187_v33, 16 }
 0x664   :  { %v1211_v42 = vpop.permute.xlu1 %1210  ;;  %3587 = vmatprep.subr.bf16.mxu1 %v4220_v12  ;;  %3679 = vmatprep.subr.bf16.mxu0 %v4220_v12  ;;  %v2593_v48 = vrot.slane %v2591_v32, 1 }
 0x665   :  { %v1214_v44 = vrot.slane %v1211_v42, 4 }
 0x666   :  { %2446 = vrot.lane.b32.xlu1 %v3188_v29, %s4224_s3  ;;  %2444 = vrot.lane.b32.xlu0 %v3187_v33, %s4224_s3 }
 0x667   :  { %v1217_v46 = vsel %vm1154_vm4, %v1214_v44, %v1211_v42  ;;  %3588 = vmatpush3.bf16.msra.mxu1 %v4630_v39  ;;  %3680 = vmatpush3.bf16.msra.mxu0 %v4632_v41  ;;  %v2579_v42 = vshll.u32 %v3187_v33, 16  ;;  %v4667_v44 = vld [vmem:[#allocation8 + $0x1d0] sm:$0xff]   ;;  %v4687_v33 = vld [vmem:[#allocation8 + $0x1c0] sm:$0xff]  }
 0x668   :  { %v1227_v19 = vsel %vm1180_vm9, %v1217_v46, %v1226_v43  ;;  %3589 = vmatprep.subr.bf16.mxu1 %v4220_v12  ;;  %3681 = vmatprep.subr.bf16.mxu0 %v4220_v12  ;;  %v4665_v43 = vld [vmem:[#allocation8 + $0x130] sm:$0xff]   ;;  %5075 = vst [vmem:[#allocation25_spill] sm:$0xff] %v4667_v44 }
 0x669   :  { %1228 = vst [vmem:[#allocation2 + $0x28] sm:$0x11] %v1227_v19  ;;  %v2581_v3 = vrot.slane %v2579_v42, 1 }
 0x66b   :  { %3590 = vmatpush3.bf16.msra.mxu1 %v4641_v25  ;;  %3682 = vmatpush3.bf16.msra.mxu0 %v4643_v50 }
 0x66c   :  { %3615 = vmatprep.subr.bf16.mxu1 %v4220_v12  ;;  %3683 = vmatprep.subr.bf16.mxu0 %v4220_v12 }
 0x66e   :  { %3592 = vmatmul.mubr.bf16.vlgmr.msra.gmra.mxu1 %v1487_v21  ;;  %v4677_v21 = vld [vmem:[#allocation8 + $0x1c8] sm:$0xff]  }
 0x66f   :  { %3616 = vmatpush3.bf16.msra.mxu1 %v4654_v20  ;;  %3684 = vmatpush3.bf16.msra.mxu0 %v4656_v22  ;;  %v2589_v22 = vshrl.u32 %v3188_v29, 16 }
 0x670   :  { %3617 = vmatprep.subr.bf16.mxu1 %v4220_v12  ;;  %3685 = vmatprep.subr.bf16.mxu0 %v4220_v12  ;;  %v2562_v46 = vld [vmem:[#allocation2 + $0x28] sm:$0x11] }
 0x671   :  { %v3195_v19 = vcombine.high %v2562_v46, %v2562_v46  ;;  %v3194_v50 = vcombine.low %v2562_v46, %v2562_v46  ;;  %3631 = vmatprep.mubr.msk.bf16.mxu1 %vm4222_vm8, %v4220_v12  ;;  %v2594_v32 = vor.u32 %v2593_v48, %v2589_v22  ;;  %v2582_v46 = vor.u32 %v2581_v3, %v2577_v59  ;;  %v2130_v59 = vpop.permute.xlu0 %2129 }
 0x672   :  { %v3198_v48 = vcombine.high %v2749_v24, %v4616_v63  ;;  %v2131_v3 = vsel %vm1278_vm12, %v4618_v58, %v2130_v59  ;;  %v4718_v58 = vld [vmem:[#allocation8 + $0x108] sm:$0xff]  }
 0x673   :  { %3618 = vmatpush3.bf16.msra.mxu1 %v4665_v43  ;;  %3686 = vmatpush3.bf16.msra.mxu0 %v4667_v44  ;;  %v2596_v41 = vshll.u32 %v3195_v19, 16  ;;  %v2584_v60 = vshll.u32 %v3194_v50, 16  ;;  %v2756_v22 = vrot.slane %v3194_v50, 1  ;;  %v4794_v59 = vld [vmem:[#allocation8 + $0x228] sm:$0xff]  }
 0x674   :  { %3619 = vmatprep.subr.bf16.mxu1 %v4220_v12  ;;  %3687 = vmatprep.subr.bf16.mxu0 %v4220_v12 }
 0x675   :  { %v2598_v42 = vrot.slane %v2596_v41, 1  ;;  %v2586_v30 = vrot.slane %v2584_v60, 1  ;;  %v3197_v60 = vcombine.low %v2749_v24, %v4616_v63  ;;  %v2759_v41 = vrot.slane %v3195_v19, 1  ;;  %v4708_v19 = vld [vmem:[#allocation8 + $0x110] sm:$0xff]  }
 0x677   :  { %3620 = vmatpush3.bf16.msra.mxu1 %v4675_v37  ;;  %3688 = vmatpush3.bf16.msra.mxu0 %v4677_v21  ;;  %v2599_v44 = vsel %vm1608_vm11, %v2594_v32, %v2598_v42  ;;  %v2587_v29 = vsel %vm1608_vm11, %v2582_v46, %v2586_v30  ;;  %v4697_v30 = vld [vmem:[#allocation8 + $0x118] sm:$0xff]   ;;  %v2758_v32 = vrot.slane %v3198_v48, 1  ;;  %v2755_v24 = vrot.slane %v3197_v60, 1  ;;  %v4788_v60 = vld [vmem:[#allocation8 + $0x230] sm:$0xff]  }
 0x678   :  { %2602 = vrot.lane.b32.xlu1 %v2599_v44, %s4223_s2  ;;  %2600 = vrot.lane.b32.xlu0 %v2587_v29, %s4223_s2  ;;  %v4783_v48 = vld [vmem:[#allocation8 + $0x238] sm:$0xff]  }
 0x679   :  { %3621 = vmatprep.subr.bf16.mxu1 %v4220_v12  ;;  %3689 = vmatprep.subr.bf16.mxu0 %v4220_v12  ;;  %v2760_v63 = vsel %vm2002_vm10, %v2758_v32, %v2759_v41  ;;  %v2757_v50 = vsel %vm2002_vm10, %v2755_v24, %v2756_v22  ;;  %v4798_v41 = vld [vmem:[#allocation8 + $0x220] sm:$0xff]   ;;  %v4804_v22 = vld [vmem:[#allocation8 + $0x218] sm:$0xff]   ;;  %v4810_v24 = vld [vmem:[#allocation8 + $0x210] sm:$0xff]  }
 0x67b   :  { %3622 = vmatpush3.bf16.msra.mxu1 %v4685_v23  ;;  %3690 = vmatpush3.bf16.msra.mxu0 %v4687_v33 }
 0x67c   :  { %2651 = vrot.lane.b32.xlu1 %v2599_v44, %s4224_s3  ;;  %2649 = vrot.lane.b32.xlu0 %v2587_v29, %s4224_s3  ;;  %v1774_v44 = vsel %vm1278_vm12, %v4598_v54, %v4600_v55  ;;  %v4755_v54 = vld [vmem:[#allocation8 + $0x1a0] sm:$0xff]   ;;  %v4763_v55 = vld [vmem:[#allocation8 + $0x198] sm:$0xff]   ;;  %v4775_v29 = vld [vmem:[#allocation8 + $0x188] sm:$0xff]  }
 0x67d   :  { %3623 = vmatprep.subr.bf16.mxu1 %v4220_v12  ;;  %3715 = vmatprep.subr.bf16.mxu0 %v4220_v12 }
 0x67e   :  { %3692 = vmatmul.mubr.bf16.vlgmr.msra.gmra.mxu0 %v2131_v3 }
 0x67f   :  { %3624 = vmatpush3.bf16.msra.mxu1 %v4697_v30  ;;  %3716 = vmatpush3.bf16.msra.mxu0 %v4388_v5  ;;  %v4726_v5 = vld [vmem:[#allocation8 + $0x100] sm:$0xff]  }
 0x680   :  { %2763 = vrot.lane.b32.xlu1 %v2760_v63, %s4223_s2  ;;  %2761 = vrot.lane.b32.xlu0 %v2757_v50, %s4223_s2 }
 0x681   :  { %3625 = vmatprep.subr.bf16.mxu1 %v4220_v12  ;;  %3717 = vmatprep.subr.bf16.mxu0 %v4220_v12 }
 0x682   :  { %3731 = vmatprep.mubr.msk.bf16.mxu0 %vm4222_vm8, %v4220_v12 }
 0x683   :  { %3626 = vmatpush3.bf16.msra.mxu1 %v4708_v19  ;;  %3718 = vmatpush3.bf16.msra.mxu0 %v4391_v6  ;;  %v4732_v6 = vld [vmem:[#allocation8 + $0x1b8] sm:$0xff]  }
 0x684   :  { %2812 = vrot.lane.b32.xlu1 %v2760_v63, %s4224_s3  ;;  %2810 = vrot.lane.b32.xlu0 %v2757_v50, %s4224_s3  ;;  %v4814_v50 = vld [vmem:[#allocation8 + $0x208] sm:$0xff]  }
 0x685   :  { %3627 = vmatprep.subr.bf16.mxu1 %v4220_v12  ;;  %3719 = vmatprep.subr.bf16.mxu0 %v4220_v12 }
 0x687   :  { %3628 = vmatpush3.bf16.msra.mxu1 %v4718_v58  ;;  %3720 = vmatpush3.bf16.msra.mxu0 %v4395_v7  ;;  %v4741_v7 = vld [vmem:[#allocation8 + $0x1b0] sm:$0xff]  }
 0x688   :  { %3629 = vmatprep.subr.bf16.mxu1 %v4220_v12  ;;  %3721 = vmatprep.subr.bf16.mxu0 %v4220_v12 }
 0x68b   :  { %3630 = vmatpush3.bf16.msra.mxu1 %v4726_v5  ;;  %3722 = vmatpush3.bf16.msra.mxu0 %v4399_v8  ;;  %v4749_v8 = vld [vmem:[#allocation8 + $0x1a8] sm:$0xff]  }
 0x68c   :  { %3655 = vmatprep.subr.bf16.mxu1 %v4220_v12  ;;  %3723 = vmatprep.subr.bf16.mxu0 %v4220_v12 }
 0x68e   :  { %3632 = vmatmul.mubr.bf16.vlgmr.msra.gmra.mxu1 %v1774_v44  ;;  %v4818_v44 = vld [vmem:[#allocation8 + $0x200] sm:$0xff]  }
 0x68f   :  { %3656 = vmatpush3.bf16.msra.mxu1 %v4732_v6  ;;  %3671 = vmatprep.mubr.msk.bf16.mxu1 %vm4222_vm8, %v4220_v12  ;;  %5077 = vst [vmem:[#allocation27_spill] sm:$0xff] %v4818_v44 }
 0x690   :  { %3657 = vmatprep.subr.bf16.mxu1 %v4220_v12  ;;  %3724 = vmatpush3.bf16.msra.mxu0 %v4403_v9 }
 0x691   :  { %3725 = vmatprep.subr.bf16.mxu0 %v4220_v12 }
 0x693   :  { %3658 = vmatpush3.bf16.msra.mxu1 %v4741_v7 }
 0x694   :  { %3659 = vmatprep.subr.bf16.mxu1 %v4220_v12  ;;  %3726 = vmatpush3.bf16.msra.mxu0 %v4407_v10 }
 0x695   :  { %3727 = vmatprep.subr.bf16.mxu0 %v4220_v12 }
 0x697   :  { %3660 = vmatpush3.bf16.msra.mxu1 %v4749_v8 }
 0x698   :  { %3661 = vmatprep.subr.bf16.mxu1 %v4220_v12  ;;  %3728 = vmatpush3.bf16.msra.mxu0 %v4411_v14  ;;  %v4771_v14 = vld [vmem:[#allocation8 + $0x190] sm:$0xff]  }
 0x699   :  { %3729 = vmatprep.subr.bf16.mxu0 %v4220_v12  ;;  %v4760_v9 = vpop.f32.mrf.mxu0 }
 0x69b   :  { %3662 = vmatpush3.bf16.msra.mxu1 %v4755_v54  ;;  %v3573_v10 = vpop.f32.mrf.mxu0 }
 0x69c   :  { %3663 = vmatprep.subr.bf16.mxu1 %v4220_v12  ;;  %3730 = vmatpush3.bf16.msra.mxu0 %v4415_v18  ;;  %v4779_v18 = vld [vmem:[#allocation8 + $0x180] sm:$0xff]   ;;  %v2244_v10 = vpop.permute.xlu1 %2243 }
 0x69d   :  { %3755 = vmatprep.subr.bf16.mxu0 %v4220_v12  ;;  %v4768_v42 = vpop.f32.mrf.mxu0 }
 0x69f   :  { %3664 = vmatpush3.bf16.msra.mxu1 %v4763_v55  ;;  %v3574_v46 = vpop.f32.mrf.mxu0 }
 0x6a0   :  { %3665 = vmatprep.subr.bf16.mxu1 %v4220_v12  ;;  %v2242_v46 = vpop.permute.xlu0 %2241 }
 0x6a3   :  { %3666 = vmatpush3.bf16.msra.mxu1 %v4771_v14 }
 0x6a4   :  { %3667 = vmatprep.subr.bf16.mxu1 %v4220_v12 }
 0x6a7   :  { %3668 = vmatpush3.bf16.msra.mxu1 %v4775_v29 }
 0x6a8   :  { %3669 = vmatprep.subr.bf16.mxu1 %v4220_v12 }
 0x6ab   :  { %3670 = vmatpush3.bf16.msra.mxu1 %v4779_v18 }
 0x6ac   :  { %3695 = vmatprep.subr.bf16.mxu1 %v4220_v12 }
 0x6ae   :  { %3672 = vmatmul.mubr.bf16.vlgmr.msra.gmra.mxu1 %v4496_v34 }
 0x6af   :  { %3696 = vmatpush3.bf16.msra.mxu1 %v4783_v48  ;;  %3711 = vmatprep.mubr.msk.bf16.mxu1 %vm4222_vm8, %v4220_v12 }
 0x6b0   :  { %3697 = vmatprep.subr.bf16.mxu1 %v4220_v12 }
 0x6b3   :  { %3698 = vmatpush3.bf16.msra.mxu1 %v4788_v60 }
 0x6b4   :  { %3699 = vmatprep.subr.bf16.mxu1 %v4220_v12 }
 0x6b7   :  { %3700 = vmatpush3.bf16.msra.mxu1 %v4794_v59 }
 0x6b8   :  { %3701 = vmatprep.subr.bf16.mxu1 %v4220_v12 }
 0x6ba   :  { %v4801_v34 = vpop.f32.mrf.mxu0 }
 0x6bb   :  { %3702 = vmatpush3.bf16.msra.mxu1 %v4798_v41 }
 0x6bc   :  { %3703 = vmatprep.subr.bf16.mxu1 %v4220_v12  ;;  %v3613_v3 = vpop.f32.mrf.mxu0 }
 0x6bd   :  { %v2245_v3 = vsel %vm1486_vm13, %v2242_v46, %v2244_v10  ;;  %v5085_v46 = vld [vmem:[#allocation24_spill] sm:$0xff] }
 0x6be   :  { %v4807_v32 = vpop.f32.mrf.mxu0 }
 0x6bf   :  { %5076 = vst [vmem:[#allocation26_spill] sm:$0xff] %v4807_v32  ;;  %3704 = vmatpush3.bf16.msra.mxu1 %v4804_v22 }
 0x6c0   :  { %3705 = vmatprep.subr.bf16.mxu1 %v4220_v12  ;;  %v3614_v63 = vpop.f32.mrf.mxu0 }
 0x6c3   :  { %3706 = vmatpush3.bf16.msra.mxu1 %v4810_v24 }
 0x6c4   :  { %3707 = vmatprep.subr.bf16.mxu1 %v4220_v12 }
 0x6c7   :  { %3708 = vmatpush3.bf16.msra.mxu1 %v4814_v50 }
 0x6c8   :  { %3709 = vmatprep.subr.bf16.mxu1 %v4220_v12 }
 0x6cb   :  { %3710 = vmatpush3.bf16.msra.mxu1 %v4818_v44 }
 0x6cc   :  { %3735 = vmatprep.subr.bf16.mxu1 %v4220_v12 }
 0x6ce   :  { %3712 = vmatmul.mubr.bf16.vlgmr.msra.gmra.mxu1 %v2245_v3 }
 0x6cf   :  { %3736 = vmatpush3.bf16.msra.mxu1 %v4322_v11  ;;  %3751 = vmatprep.mubr.msk.bf16.mxu1 %vm4222_vm8, %v4220_v12  ;;  %v4093_v11 = vld [vmem:[#allocation2 + $0x18] ss:$8 sps:$4 sm:$0xff]  }
 0x6d0   :  { %3737 = vmatprep.subr.bf16.mxu1 %v4220_v12 }
 0x6d3   :  { %3738 = vmatpush3.bf16.msra.mxu1 %v4327_v13 }
 0x6d4   :  { %v2353_v63 = vpop.permute.xlu1 %2352  ;;  %3739 = vmatprep.subr.bf16.mxu1 %v4220_v12  ;;  %v2351_v32 = vpop.permute.xlu0 %2350 }
 0x6d5   :  { %v2354_v44 = vsel %vm1278_vm12, %v2351_v32, %v2353_v63  ;;  %v5086_v63 = vld [vmem:[#allocation25_spill] sm:$0xff] }
 0x6d6   :  { %3732 = vmatmul.mubr.bf16.vlgmr.msra.gmra.mxu0 %v2354_v44 }
 0x6d7   :  { %3740 = vmatpush3.bf16.msra.mxu1 %v4331_v15  ;;  %3756 = vmatpush3.bf16.msra.mxu0 %v4569_v28 }
 0x6d8   :  { %3741 = vmatprep.subr.bf16.mxu1 %v4220_v12  ;;  %3757 = vmatprep.subr.bf16.mxu0 %v4220_v12  ;;  %v2447_v13 = vpop.permute.xlu1 %2446  ;;  %v2445_v15 = vpop.permute.xlu0 %2444 }
 0x6d9   :  { %3771 = vmatprep.mubr.msk.bf16.mxu0 %vm4222_vm8, %v4220_v12 }
 0x6db   :  { %3742 = vmatpush3.bf16.msra.mxu1 %v4335_v16  ;;  %3758 = vmatpush3.bf16.msra.mxu0 %v4573_v35  ;;  %v2448_v16 = vsel %vm1486_vm13, %v2445_v15, %v2447_v13 }
 0x6dc   :  { %3743 = vmatprep.subr.bf16.mxu1 %v4220_v12  ;;  %3759 = vmatprep.subr.bf16.mxu0 %v4220_v12 }
 0x6df   :  { %3744 = vmatpush3.bf16.msra.mxu1 %v4339_v17  ;;  %3760 = vmatpush3.bf16.msra.mxu0 %v4583_v38  ;;  %v2493_v17 = vld [vmem:[#allocation2 + $0x18] sm:$0xf] }
 0x6e0   :  { %3745 = vmatprep.subr.bf16.mxu1 %v4220_v12  ;;  %3761 = vmatprep.subr.bf16.mxu0 %v4220_v12 }
 0x6e3   :  { %3746 = vmatpush3.bf16.msra.mxu1 %v4355_v36  ;;  %3762 = vmatpush3.bf16.msra.mxu0 %v4589_v47  ;;  %v4878_v36 = vld [vmem:[#allocation2 + $0x20] sm:$0xf] }
 0x6e4   :  { %3747 = vmatprep.subr.bf16.mxu1 %v4220_v12  ;;  %3763 = vmatprep.subr.bf16.mxu0 %v4220_v12 }
 0x6e7   :  { %3748 = vmatpush3.bf16.msra.mxu1 %v4361_v26  ;;  %3764 = vmatpush3.bf16.msra.mxu0 %v4604_v56  ;;  %v3190_v26 = vcombine.low %v2493_v17, %v4878_v36  ;;  %v5087_v17 = vld [vmem:[#allocation26_spill] sm:$0xff] }
 0x6e8   :  { %3749 = vmatprep.subr.bf16.mxu1 %v4220_v12  ;;  %3765 = vmatprep.subr.bf16.mxu0 %v4220_v12 }
 0x6ea   :  { %v2601_v35 = vpop.permute.xlu0 %2600 }
 0x6eb   :  { %3750 = vmatpush3.bf16.msra.mxu1 %v4367_v51  ;;  %3766 = vmatpush3.bf16.msra.mxu0 %v4610_v61  ;;  %v4885_v51 = vld [vmem:[#allocation2 + $0x28] ss:$0 sps:$4 sm:$0x11]  }
 0x6ec   :  { %3775 = vmatprep.subr.bf16.mxu1 %v4220_v12  ;;  %3767 = vmatprep.subr.bf16.mxu0 %v4220_v12 }
 0x6ee   :  { %3752 = vmatmul.mubr.bf16.vlgmr.msra.gmra.mxu1 %v4093_v11 }
 0x6ef   :  { %3776 = vmatpush3.bf16.msra.mxu1 %v4468_v45  ;;  %3768 = vmatpush3.bf16.msra.mxu0 %v4630_v39  ;;  %v2507_v45 = vshll.u32 %v3190_v26, 16  ;;  %v5079_v39 = vld [vmem:[#allocation18_spill] sm:$0xff] }
 0x6f0   :  { %3777 = vmatprep.subr.bf16.mxu1 %v4220_v12  ;;  %3769 = vmatprep.subr.bf16.mxu0 %v4220_v12 }
 0x6f1   :  { %3791 = vmatprep.mubr.msk.bf16.mxu1 %vm4222_vm8, %v4220_v12 }
 0x6f3   :  { %3778 = vmatpush3.bf16.msra.mxu1 %v4473_v49  ;;  %3770 = vmatpush3.bf16.msra.mxu0 %v4641_v25  ;;  %v2512_v49 = vshll.u32 %v4885_v51, 16  ;;  %v2650_v25 = vpop.permute.xlu0 %2649 }
 0x6f4   :  { %3779 = vmatprep.subr.bf16.mxu1 %v4220_v12  ;;  %3795 = vmatprep.subr.bf16.mxu0 %v4220_v12 }
 0x6f6   :  { %3772 = vmatmul.mubr.bf16.vlgmr.msra.gmra.mxu0 %v2448_v16 }
 0x6f7   :  { %3780 = vmatpush3.bf16.msra.mxu1 %v4485_v0  ;;  %3796 = vmatpush3.bf16.msra.mxu0 %v4654_v20  ;;  %v2509_v0 = vrot.slane %v2507_v45, 1  ;;  %v5080_v20 = vld [vmem:[#allocation19_spill] sm:$0xff]  ;;  %v2762_v11 = vpop.permute.xlu0 %2761 }
 0x6f8   :  { %3781 = vmatprep.subr.bf16.mxu1 %v4220_v12  ;;  %3797 = vmatprep.subr.bf16.mxu0 %v4220_v12  ;;  %v5088_v45 = vld [vmem:[#allocation27_spill] sm:$0xff] }
 0x6f9   :  { %3811 = vmatprep.mubr.msk.bf16.mxu0 %vm4222_vm8, %v4220_v12 }
 0x6fb   :  { %3782 = vmatpush3.bf16.msra.mxu1 %v4493_v31  ;;  %3798 = vmatpush3.bf16.msra.mxu0 %v4665_v43  ;;  %v2505_v31 = vshrl.u32 %v3190_v26, 16  ;;  %v2698_v43 = vld [vmem:[#allocation2 + $0x18] sm:$0xe] }
 0x6fc   :  { %3783 = vmatprep.subr.bf16.mxu1 %v4220_v12  ;;  %3799 = vmatprep.subr.bf16.mxu0 %v4220_v12 }
 0x6ff   :  { %3784 = vmatpush3.bf16.msra.mxu1 %v4506_v40  ;;  %3800 = vmatpush3.bf16.msra.mxu0 %v4675_v37  ;;  %v2514_v40 = vrot.slane %v2512_v49, 1 }
 0x700   :  { %3785 = vmatprep.subr.bf16.mxu1 %v4220_v12  ;;  %3801 = vmatprep.subr.bf16.mxu0 %v4220_v12 }
 0x703   :  { %3786 = vmatpush3.bf16.msra.mxu1 %v4512_v27  ;;  %3802 = vmatpush3.bf16.msra.mxu0 %v4685_v23  ;;  %v2510_v27 = vor.u32 %v2509_v0, %v2505_v31 }
 0x704   :  { %3787 = vmatprep.subr.bf16.mxu1 %v4220_v12  ;;  %3803 = vmatprep.subr.bf16.mxu0 %v4220_v12 }
 0x707   :  { %3788 = vmatpush3.bf16.msra.mxu1 %v4520_v52  ;;  %3804 = vmatpush3.bf16.msra.mxu0 %v4697_v30  ;;  %v2515_v52 = vsel %vm1608_vm11, %v2510_v27, %v2514_v40 }
 0x708   :  { %3789 = vmatprep.subr.bf16.mxu1 %v4220_v12  ;;  %3805 = vmatprep.subr.bf16.mxu0 %v4220_v12 }
 0x70b   :  { %3790 = vmatpush3.bf16.msra.mxu1 %v4528_v57  ;;  %3806 = vmatpush3.bf16.msra.mxu0 %v4708_v19  ;;  %v2603_v57 = vpop.permute.xlu1 %2602 }
 0x70c   :  { %3815 = vmatprep.subr.bf16.mxu1 %v4220_v12  ;;  %3807 = vmatprep.subr.bf16.mxu0 %v4220_v12 }
 0x70e   :  { %3792 = vmatmul.mubr.bf16.vlgmr.msra.gmra.mxu1 %v2515_v52  ;;  %v1363_v23 = vpop.f32.mrf.mxu1 }
 0x70f   :  { %3816 = vmatpush3.bf16.msra.mxu1 %v4533_v62  ;;  %3808 = vmatpush3.bf16.msra.mxu0 %v4718_v58  ;;  %v2604_v62 = vsel %vm1278_vm12, %v2601_v35, %v2603_v57  ;;  %v1459_v30 = vadd.f32 %v4760_v9, %v1363_v23 }
 0x710   :  { %v3553_v28 = vpop.f32.mrf.mxu1  ;;  %3817 = vmatprep.subr.bf16.mxu1 %v4220_v12  ;;  %3809 = vmatprep.subr.bf16.mxu0 %v4220_v12 }
 0x711   :  { %3831 = vmatprep.mubr.msk.bf16.mxu1 %vm4222_vm8, %v4220_v12 }
 0x712   :  { %v1366_v38 = vpop.f32.mrf.mxu1 }
 0x713   :  { %3818 = vmatpush3.bf16.msra.mxu1 %v4538_v53  ;;  %3810 = vmatpush3.bf16.msra.mxu0 %v4726_v5  ;;  %v5081_v5 = vld [vmem:[#allocation20_spill] sm:$0xff] }
 0x714   :  { %v3554_v47 = vpop.f32.mrf.mxu1  ;;  %3819 = vmatprep.subr.bf16.mxu1 %v4220_v12  ;;  %3835 = vmatprep.subr.bf16.mxu0 %v4220_v12 }
 0x716   :  { %3812 = vmatmul.mubr.bf16.vlgmr.msra.gmra.mxu0 %v2604_v62 }
 0x717   :  { %3820 = vmatpush3.bf16.msra.mxu1 %v4544_v1  ;;  %3836 = vmatpush3.bf16.msra.mxu0 %v4732_v6  ;;  %v3196_v6 = vcombine.low %v2698_v43, %v4878_v36 }
 0x718   :  { %3821 = vmatprep.subr.bf16.mxu1 %v4220_v12  ;;  %3837 = vmatprep.subr.bf16.mxu0 %v4220_v12 }
 0x719   :  { %3851 = vmatprep.mubr.msk.bf16.mxu0 %vm4222_vm8, %v4220_v12 }
 0x71b   :  { %3822 = vmatpush3.bf16.msra.mxu1 %v4548_v2  ;;  %3838 = vmatpush3.bf16.msra.mxu0 %v4741_v7  ;;  %v5078_v2 = vld [vmem:[#allocation17_spill] sm:$0xff] }
 0x71c   :  { %3823 = vmatprep.subr.bf16.mxu1 %v4220_v12  ;;  %3839 = vmatprep.subr.bf16.mxu0 %v4220_v12 }
 0x71e   :  { %v4922_v53 = vpop.f32.mrf.mxu0 }
 0x71f   :  { %3824 = vmatpush3.bf16.msra.mxu1 %v4552_v4  ;;  %3840 = vmatpush3.bf16.msra.mxu0 %v4749_v8  ;;  %v2652_v4 = vpop.permute.xlu1 %2651  ;;  %v1462_v8 = vadd.f32 %v4768_v42, %v1366_v38  ;;  %v5083_v42 = vld [vmem:[#allocation22_spill] sm:$0xff] }
 0x720   :  { %v3653_v1 = vpop.f32.mrf.mxu0  ;;  %3825 = vmatprep.subr.bf16.mxu1 %v4220_v12  ;;  %3841 = vmatprep.subr.bf16.mxu0 %v4220_v12  ;;  %v2653_v37 = vsel %vm1486_vm13, %v2650_v25, %v2652_v4 }
 0x722   :  { %v4928_v56 = vpop.f32.mrf.mxu0 }
 0x723   :  { %3826 = vmatpush3.bf16.msra.mxu1 %v5078_v2  ;;  %3842 = vmatpush3.bf16.msra.mxu0 %v4755_v54  ;;  %v2703_v54 = vrot.slane %v4885_v51, 1 }
 0x724   :  { %v3654_v61 = vpop.f32.mrf.mxu0  ;;  %3827 = vmatprep.subr.bf16.mxu1 %v4220_v12  ;;  %3843 = vmatprep.subr.bf16.mxu0 %v4220_v12 }
 0x727   :  { %3828 = vmatpush3.bf16.msra.mxu1 %v5079_v39  ;;  %3844 = vmatpush3.bf16.msra.mxu0 %v4763_v55 }
 0x728   :  { %3829 = vmatprep.subr.bf16.mxu1 %v4220_v12  ;;  %3845 = vmatprep.subr.bf16.mxu0 %v4220_v12 }
 0x72b   :  { %3830 = vmatpush3.bf16.msra.mxu1 %v5080_v20  ;;  %3846 = vmatpush3.bf16.msra.mxu0 %v4771_v14  ;;  %v5082_v14 = vld [vmem:[#allocation21_spill] sm:$0xff] }
 0x72c   :  { %3855 = vmatprep.subr.bf16.mxu1 %v4220_v12  ;;  %3847 = vmatprep.subr.bf16.mxu0 %v4220_v12 }
 0x72e   :  { %v1571_v19 = vpop.f32.mrf.mxu1  ;;  %3832 = vmatmul.mubr.bf16.vlgmr.msra.gmra.mxu1 %v2653_v37 }
 0x72f   :  { %v1578_v58 = vadd.f32 %v1571_v19, %v1459_v30  ;;  %3856 = vmatpush3.bf16.msra.mxu1 %v5081_v5  ;;  %3848 = vmatpush3.bf16.msra.mxu0 %v4775_v29  ;;  %v2702_v29 = vrot.slane %v3196_v6, 1 }
 0x730   :  { %v3593_v7 = vpop.f32.mrf.mxu1  ;;  %3857 = vmatprep.subr.bf16.mxu1 %v4220_v12  ;;  %3849 = vmatprep.subr.bf16.mxu0 %v4220_v12 }
 0x731   :  { %3871 = vmatprep.mubr.msk.bf16.mxu1 %vm4222_vm8, %v4220_v12  ;;  %v2704_v44 = vsel %vm2002_vm10, %v2702_v29, %v2703_v54  ;;  %v1711_v13 = vadd.f32 %v4801_v34, %v1578_v58 }
 0x732   :  { %v1574_v9 = vpop.f32.mrf.mxu1 }
 0x733   :  { %v1579_v55 = vadd.f32 %v1574_v9, %v1462_v8  ;;  %3858 = vmatpush3.bf16.msra.mxu1 %v5082_v14  ;;  %3850 = vmatpush3.bf16.msra.mxu0 %v4779_v18  ;;  %v5084_v18 = vld [vmem:[#allocation23_spill] sm:$0xff] }
 0x734   :  { %v3594_v32 = vpop.f32.mrf.mxu1  ;;  %3859 = vmatprep.subr.bf16.mxu1 %v4220_v12  ;;  %3875 = vmatprep.subr.bf16.mxu0 %v4220_v12 }
 0x735   :  { %v1712_v36 = vadd.f32 %v5087_v17, %v1579_v55 }
 0x736   :  { %3852 = vmatmul.mubr.bf16.vlgmr.msra.gmra.mxu0 %v2704_v44 }
 0x737   :  { %3860 = vmatpush3.bf16.msra.mxu1 %v5083_v42  ;;  %3876 = vmatpush3.bf16.msra.mxu0 %v4783_v48 }
 0x738   :  { %3861 = vmatprep.subr.bf16.mxu1 %v4220_v12  ;;  %3877 = vmatprep.subr.bf16.mxu0 %v4220_v12 }
 0x739   :  { %3891 = vmatprep.mubr.msk.bf16.mxu0 %vm4222_vm8, %v4220_v12 }
 0x73b   :  { %3862 = vmatpush3.bf16.msra.mxu1 %v5084_v18  ;;  %3878 = vmatpush3.bf16.msra.mxu0 %v4788_v60 }
 0x73c   :  { %3863 = vmatprep.subr.bf16.mxu1 %v4220_v12  ;;  %3879 = vmatprep.subr.bf16.mxu0 %v4220_v12 }
 0x73e   :  { %v2215_v10 = vpop.f32.mrf.mxu0 }
 0x73f   :  { %3864 = vmatpush3.bf16.msra.mxu1 %v5085_v46  ;;  %3880 = vmatpush3.bf16.msra.mxu0 %v4794_v59  ;;  %v2764_v59 = vpop.permute.xlu1 %2763 }
 0x740   :  { %v3693_v48 = vpop.f32.mrf.mxu0  ;;  %3865 = vmatprep.subr.bf16.mxu1 %v4220_v12  ;;  %3881 = vmatprep.subr.bf16.mxu0 %v4220_v12 }
 0x742   :  { %v2218_v3 = vpop.f32.mrf.mxu0 }
 0x743   :  { %3866 = vmatpush3.bf16.msra.mxu1 %v5086_v63  ;;  %3882 = vmatpush3.bf16.msra.mxu0 %v4798_v41  ;;  %v2765_v41 = vsel %vm1278_vm12, %v2762_v11, %v2764_v59  ;;  %v2813_v16 = vpop.permute.xlu1 %2812 }
 0x744   :  { %v3694_v60 = vpop.f32.mrf.mxu0  ;;  %3867 = vmatprep.subr.bf16.mxu1 %v4220_v12  ;;  %3883 = vmatprep.subr.bf16.mxu0 %v4220_v12 }
 0x747   :  { %3868 = vmatpush3.bf16.msra.mxu1 %v4677_v21  ;;  %3884 = vmatpush3.bf16.msra.mxu0 %v4804_v22 }
 0x748   :  { %3869 = vmatprep.subr.bf16.mxu1 %v4220_v12  ;;  %3885 = vmatprep.subr.bf16.mxu0 %v4220_v12 }
 0x74b   :  { %3870 = vmatpush3.bf16.msra.mxu1 %v4687_v33  ;;  %3886 = vmatpush3.bf16.msra.mxu0 %v4810_v24  ;;  %v2811_v24 = vpop.permute.xlu0 %2810 }
 0x74c   :  { %3887 = vmatprep.subr.bf16.mxu0 %v4220_v12  ;;  %v2814_v34 = vsel %vm1486_vm13, %v2811_v24, %v2813_v16 }
 0x74e   :  { %v1858_v15 = vpop.f32.mrf.mxu1  ;;  %3872 = vmatmul.mubr.bf16.vlgmr.msra.gmra.mxu1 %v2765_v41 }
 0x74f   :  { %v1865_v21 = vadd.f32 %v1858_v15, %v1711_v13  ;;  %3888 = vmatpush3.bf16.msra.mxu0 %v4814_v50 }
 0x750   :  { %v3633_v22 = vpop.f32.mrf.mxu1  ;;  %3889 = vmatprep.subr.bf16.mxu0 %v4220_v12 }
 0x751   :  { %v1979_v33 = vadd.f32 %v4922_v53, %v1865_v21 }
 0x752   :  { %v1861_v26 = vpop.f32.mrf.mxu1 }
 0x753   :  { %v1866_v51 = vadd.f32 %v1861_v26, %v1712_v36  ;;  %3890 = vmatpush3.bf16.msra.mxu0 %v5088_v45 }
 0x754   :  { %v3634_v49 = vpop.f32.mrf.mxu1 }
 0x755   :  { %v1980_v0 = vadd.f32 %v4928_v56, %v1866_v51 }
 0x756   :  { %3892 = vmatmul.mubr.bf16.vlgmr.msra.gmra.mxu0 %v2814_v34 }
 0x76e   :  { %v2089_v50 = vpop.f32.mrf.mxu1 }
 0x76f   :  { %v2096_v31 = vadd.f32 %v2089_v50, %v1979_v33 }
 0x770   :  { %v3673_v40 = vpop.f32.mrf.mxu1 }
 0x771   :  { %v2222_v12 = vadd.f32 %v2215_v10, %v2096_v31 }
 0x772   :  { %v2092_v27 = vpop.f32.mrf.mxu1 }
 0x773   :  { %v2097_v52 = vadd.f32 %v2092_v27, %v1980_v0 }
 0x774   :  { %v3674_v23 = vpop.f32.mrf.mxu1 }
 0x775   :  { %v2223_v28 = vadd.f32 %v2218_v3, %v2097_v52 }
 0x78e   :  { %v2329_v57 = vpop.f32.mrf.mxu1 }
 0x78f   :  { %v4992_v35 = vadd.f32 %v2329_v57, %v2222_v12 }
 0x790   :  { %v3713_v38 = vpop.f32.mrf.mxu1 }
 0x792   :  { %v2332_v47 = vpop.f32.mrf.mxu1 }
 0x793   :  { %v4994_v62 = vadd.f32 %v2332_v47, %v2223_v28 }
 0x794   :  { %v3714_v53 = vpop.f32.mrf.mxu1 }
 0x795   :  { %v2861_v13 = vadd.f32 %v4994_v62, %v4992_v35 }
 0x796   :  { %v2390_v1 = vpop.f32.mrf.mxu0 }
 0x797   :  { %v2862_v36 = vrot.slane %v2861_v13, 4 }
 0x798   :  { %v3733_v2 = vpop.f32.mrf.mxu0 }
 0x799   :  { %v2863_v34 = vadd.f32 %v2862_v36, %v2861_v13 }
 0x79a   :  { %v2393_v56 = vpop.f32.mrf.mxu0 }
 0x79b   :  { %v2864_v52 = vrot.slane %v2863_v34, 2 }
 0x79c   :  { %v3734_v61 = vpop.f32.mrf.mxu0 }
 0x79d   :  { %v2865_v38 = vadd.f32 %v2864_v52, %v2863_v34  ;;  %v3212_v52 = vld [vmem:[#allocation9] sm:$0xff]  }
 0x79f   :  { %v2866_v53 = vrot.slane %v2865_v38, 1 }
 0x7ae   :  { %v2437_v39 = vpop.f32.mrf.mxu1 }
 0x7af   :  { %v2438_v4 = vadd.f32 %v2437_v39, %v2390_v1 }
 0x7b0   :  { %v3753_v25 = vpop.f32.mrf.mxu1 }
 0x7b2   :  { %v2440_v20 = vpop.f32.mrf.mxu1 }
 0x7b3   :  { %v2441_v43 = vadd.f32 %v2440_v20, %v2393_v56  ;;  %v2867_v56 = vadd.f32 %v2866_v53, %v2865_v38  ;;  %v3214_v53 = vunpack.c.h.bf16 %v3212_v52 }
 0x7b4   :  { %v3754_v37 = vpop.f32.mrf.mxu1 }
 0x7b6   :  { %v2484_v30 = vpop.f32.mrf.mxu0 }
 0x7b7   :  { %v2491_v19 = vadd.f32 %v2484_v30, %v2438_v4 }
 0x7b8   :  { %v3773_v58 = vpop.f32.mrf.mxu0 }
 0x7ba   :  { %v2487_v5 = vpop.f32.mrf.mxu0 }
 0x7bb   :  { %v2492_v6 = vadd.f32 %v2487_v5, %v2441_v43 }
 0x7bc   :  { %v3774_v7 = vpop.f32.mrf.mxu0 }
 0x7ce   :  { %v2551_v8 = vpop.f32.mrf.mxu1 }
 0x7cf   :  { %v2558_v54 = vadd.f32 %v2551_v8, %v2491_v19 }
 0x7d0   :  { %v3793_v9 = vpop.f32.mrf.mxu1 }
 0x7d2   :  { %v2554_v55 = vpop.f32.mrf.mxu1 }
 0x7d3   :  { %v2559_v15 = vadd.f32 %v2554_v55, %v2492_v6  ;;  %v5089_v6 = vld [vmem:[#allocation16_spill] sm:$0xff] }
 0x7d4   :  { %v3794_v14 = vpop.f32.mrf.mxu1 }
 0x7d6   :  { %v2640_v29 = vpop.f32.mrf.mxu0 }
 0x7d7   :  { %v2647_v22 = vadd.f32 %v2640_v29, %v2558_v54 }
 0x7d8   :  { %v3813_v32 = vpop.f32.mrf.mxu0 }
 0x7da   :  { %v2643_v44 = vpop.f32.mrf.mxu0 }
 0x7db   :  { %v2648_v16 = vadd.f32 %v2643_v44, %v2559_v15 }
 0x7dc   :  { %v3814_v42 = vpop.f32.mrf.mxu0 }
 0x7ee   :  { %v2689_v18 = vpop.f32.mrf.mxu1 }
 0x7ef   :  { %v2696_v33 = vadd.f32 %v2689_v18, %v2647_v22 }
 0x7f0   :  { %v3833_v10 = vpop.f32.mrf.mxu1 }
 0x7f2   :  { %v2692_v46 = vpop.f32.mrf.mxu1 }
 0x7f3   :  { %v2697_v24 = vadd.f32 %v2692_v46, %v2648_v16 }
 0x7f4   :  { %v3834_v48 = vpop.f32.mrf.mxu1 }
 0x7f6   :  { %v2740_v3 = vpop.f32.mrf.mxu0 }
 0x7f7   :  { %v2747_v51 = vadd.f32 %v2740_v3, %v2696_v33 }
 0x7f8   :  { %v3853_v63 = vpop.f32.mrf.mxu0 }
 0x7fa   :  { %v2743_v60 = vpop.f32.mrf.mxu0 }
 0x7fb   :  { %v2748_v45 = vadd.f32 %v2743_v60, %v2697_v24 }
 0x7fc   :  { %v3854_v59 = vpop.f32.mrf.mxu0 }
 0x80e   :  { %v2801_v11 = vpop.f32.mrf.mxu1 }
 0x80f   :  { %v2808_v0 = vadd.f32 %v2801_v11, %v2747_v51 }
 0x810   :  { %v3873_v41 = vpop.f32.mrf.mxu1 }
 0x812   :  { %v2804_v21 = vpop.f32.mrf.mxu1 }
 0x813   :  { %v2809_v50 = vadd.f32 %v2804_v21, %v2748_v45 }
 0x814   :  { %v3874_v17 = vpop.f32.mrf.mxu1 }
 0x816   :  { %v2850_v26 = vpop.f32.mrf.mxu0 }
 0x817   :  { %v4998_v40 = vadd.f32 %v2850_v26, %v2808_v0  ;;  %v2859_v0 = vld [vmem:[%s5040_s5] sm:$0x1]  ;;  %s4225_s5 = smov [#allocation11]  }
 0x818   :  { %v3893_v49 = vpop.f32.mrf.mxu0 }
 0x81a   :  { %v2853_v31 = vpop.f32.mrf.mxu0 }
 0x81b   :  { %v5000_v12 = vadd.f32 %v2853_v31, %v2809_v50 }
 0x81c   :  { %v3894_v27 = vpop.f32.mrf.mxu0 }
 0x81d   :  { %v2868_v23 = vadd.f32 %v5000_v12, %v4998_v40  ;;  %v2860_v27 = vld [vmem:[%s5041_s6] sm:$0x1]  ;;  %s2995_s6 = sshll.u32 %s4225_s5, 4  ;;  %s2996_s6 = int_to_ptr.vmem [resolvable:$true] %s2995_s6 }
 0x81e   :  { %s4181_s16 = scalar_lea.vmem %s2996_s6, 256  ;;  %p4186_p7 = scmp.lt.s32.totalorder %s2996_s6, %s2996_s6 }
 0x81f   :  { %v2869_v28 = vrot.slane %v2868_v23, 4  ;;  %p4182_p6 = scmp.ne.s32.totalorder %s2996_s6, %s4181_s16  ;;  %p4187_p8 = scmp.lt.s32.totalorder %s4181_s16, %s4181_s16 }
 0x821   :  { %v2870_v57 = vadd.f32 %v2869_v28, %v2868_v23  ;;  %p4188_p9 = por %p4187_p8, %p4186_p7 }
 0x823   :  { %v2871_v47 = vrot.slane %v2870_v57, 2  ;;  %p4189_p10 = pnand %p4188_p9, %p4182_p6 }
 0x825   :  { %v2872_v1 = vadd.f32 %v2871_v47, %v2870_v57  ;;  %v3229_v57 = vld [vmem:[#allocation9 + $0x8] sm:$0xff]   ;;  %v3213_v47 = vunpack.c.l.bf16 %v3212_v52 }
 0x827   :  { %v2873_v2 = vrot.slane %v2872_v1, 1 }
 0x829   :  { %v2874_v61 = vadd.f32 %v2873_v2, %v2872_v1  ;;  %v3222_v2 = vunpack.c.l.bf16 %v3229_v57 }
 0x82b   :  { %v2875_v39 = vadd.f32 %v2874_v61, %v2867_v56  ;;  %v3223_v56 = vunpack.c.h.bf16 %v3229_v57 }
 0x82d   :  { %2876 = vrot.lane.b32.xlu0 %v2875_v39, %s4217_s4 }
 0x89f   :  { %v2877_v4 = vpop.permute.xlu0 %2876 }
 0x8a0   :  { %v2878_v25 = vadd.f32 %v2877_v4, %v2875_v39 }
 0x8a2   :  { %2879 = vrot.lane.b32.xlu1 %v2878_v25, %s4218_s7 }
 0x914   :  { %v2880_v20 = vpop.permute.xlu1 %2879 }
 0x915   :  { %v2881_v43 = vadd.f32 %v2880_v20, %v2878_v25 }
 0x917   :  { %2882 = vrot.lane.b32.xlu0 %v2881_v43, %s4219_s27 }
 0x989   :  { %v2883_v37 = vpop.permute.xlu0 %2882 }
 0x98a   :  { %v2884_v30 = vadd.f32 %v2883_v37, %v2881_v43 }
 0x98c   :  { %2885 = vrot.lane.b32.xlu1 %v2884_v30, %s4210_s30 }
 0x9fe   :  { %v2886_v19 = vpop.permute.xlu1 %2885 }
 0x9ff   :  { %v2887_v58 = vadd.f32 %v2886_v19, %v2884_v30 }
 0xa01   :  { %v2888_v5 = vmul.f32 0.001953125, %v2887_v58 }
 0xa03   :  { %v2892_v7 = vrot.slane %v2888_v5, %v5089_v6 }
 0xa05   :  { %v2893_v8 = vsub.f32 %v4992_v35, %v2892_v7  ;;  %v2894_v54 = vsub.f32 %v4994_v62, %v2892_v7  ;;  %v2904_v9 = vsub.f32 %v4998_v40, %v2892_v7  ;;  %v2905_v55 = vsub.f32 %v5000_v12, %v2892_v7 }
 0xa07   :  { %v2895_v14 = vmul.f32 %v2893_v8, %v2893_v8  ;;  %v2896_v29 = vmul.f32 %v2894_v54, %v2894_v54  ;;  %v2906_v32 = vmul.f32 %v2904_v9, %v2904_v9  ;;  %v2907_v44 = vmul.f32 %v2905_v55, %v2905_v55 }
 0xa09   :  { %v2897_v42 = vadd.f32 %v2896_v29, %v2895_v14  ;;  %v2908_v18 = vadd.f32 %v2907_v44, %v2906_v32 }
 0xa0b   :  { %v2898_v10 = vrot.slane %v2897_v42, 4  ;;  %v2909_v46 = vrot.slane %v2908_v18, 4 }
 0xa0d   :  { %v2899_v48 = vadd.f32 %v2898_v10, %v2897_v42  ;;  %v2910_v3 = vadd.f32 %v2909_v46, %v2908_v18 }
 0xa0f   :  { %v2900_v63 = vrot.slane %v2899_v48, 2  ;;  %v2911_v60 = vrot.slane %v2910_v3, 2 }
 0xa11   :  { %v2901_v59 = vadd.f32 %v2900_v63, %v2899_v48  ;;  %v2912_v11 = vadd.f32 %v2911_v60, %v2910_v3 }
 0xa13   :  { %v2902_v41 = vrot.slane %v2901_v59, 1  ;;  %v2913_v13 = vrot.slane %v2912_v11, 1 }
 0xa15   :  { %v2903_v15 = vadd.f32 %v2902_v41, %v2901_v59  ;;  %v2914_v21 = vadd.f32 %v2913_v13, %v2912_v11 }
 0xa17   :  { %v2915_v22 = vadd.f32 %v2914_v21, %v2903_v15 }
 0xa19   :  { %2916 = vrot.lane.b32.xlu0 %v2915_v22, %s4217_s4 }
 0xa8b   :  { %v2917_v16 = vpop.permute.xlu0 %2916 }
 0xa8c   :  { %v2918_v17 = vadd.f32 %v2917_v16, %v2915_v22 }
 0xa8e   :  { %2919 = vrot.lane.b32.xlu1 %v2918_v17, %s4218_s7 }
 0xb00   :  { %v2920_v36 = vpop.permute.xlu1 %2919 }
 0xb01   :  { %v2921_v33 = vadd.f32 %v2920_v36, %v2918_v17 }
 0xb03   :  { %2922 = vrot.lane.b32.xlu0 %v2921_v33, %s4219_s27 }
 0xb75   :  { %v2923_v24 = vpop.permute.xlu0 %2922 }
 0xb76   :  { %v2924_v26 = vadd.f32 %v2923_v24, %v2921_v33 }
 0xb78   :  { %2925 = vrot.lane.b32.xlu1 %v2924_v26, %s4210_s30 }
 0xbea   :  { %v2926_v51 = vpop.permute.xlu1 %2925 }
 0xbeb   :  { %v2927_v45 = vadd.f32 %v2926_v51, %v2924_v26 }
 0xbed   :  { %v2928_v49 = vmul.f32 0.001953125, %v2927_v45 }
 0xbef   :  { %v2929_v34 = vadd.f32 1e-05, %v2928_v49 }
 0xbf1   :  { %4099 = vrsqrt.f32 %v2929_v34 }
 0xbfe   :  { %v4100_v50 = vpop.eup %4099 }
 0xbff   :  { %v2931_v31 = vmul.f32 %v4100_v50, %v2859_v0 }
 0xc01   :  { %v2932_v23 = vmul.f32 %v2931_v31, %v2888_v5  ;;  %v2942_v28 = vrot.slane %v2931_v31, %v5089_v6 }
 0xc03   :  { %v2933_v38 = vsub.f32 %v2860_v27, %v2932_v23  ;;  %v2944_v1 = vmul.f32 %v2942_v28, %v4992_v35  ;;  %v2945_v61 = vmul.f32 %v2942_v28, %v4994_v62  ;;  %v2972_v4 = vmul.f32 %v2942_v28, %v4998_v40 }
 0xc04   :  { %v2973_v25 = vmul.f32 %v2942_v28, %v5000_v12 }
 0xc05   :  { %v2950_v39 = vrot.slane %v2933_v38, %v5089_v6 }
 0xc07   :  { %v2952_v20 = vadd.f32 %v2950_v39, %v2944_v1  ;;  %v2953_v43 = vadd.f32 %v2950_v39, %v2945_v61  ;;  %v2974_v37 = vadd.f32 %v2972_v4, %v2950_v39  ;;  %v2975_v30 = vadd.f32 %v2973_v25, %v2950_v39 }
 0xc09   :  { %v2954_v19 = vadd.f32 %v3213_v47, %v2952_v20  ;;  %v2955_v58 = vadd.f32 %v3214_v53, %v2953_v43  ;;  %v2976_v5 = vadd.f32 %v3222_v2, %v2974_v37  ;;  %v2977_v7 = vadd.f32 %v3223_v56, %v2975_v30 }
 0xc0b   :  { %v2956_v35 = vmax.f32 %v2954_v19, 0.0  ;;  %v2957_v8 = vmax.f32 %v2955_v58, 0.0  ;;  %v2978_v54 = vmax.f32 %v2976_v5, 0.0  ;;  %v2979_v62 = vmax.f32 %v2977_v7, 0.0 }
 0xc0d   :  { %v3218_v9 = vpack.c.bf16 %v2957_v8, %v2956_v35  ;;  %v3227_v6 = vpack.c.bf16 %v2979_v62, %v2978_v54 }
 0xc0f   :  { %3219 = vst [vmem:[#allocation11] sm:$0xff] %v3218_v9   ;;  %3230 = vst [vmem:[#allocation11 + $0x8] sm:$0xff] %v3227_v6  }
 0xc10   :  { %4192 = shalt.err (!%p4189_p10)
}
 0xc11   :  { %3001 = dma.vmem_to_hbm [thread:$0]  %s2996_s6, 256, %s5043_s8, [#allocation5], %s4210_s30, %s4210_s30, %s4211_s9  }
 0xc12   :  { %4207 = dma.done.wait [#allocation5], 256  }
 0xc13   :  { %4208 = vsyncadd [#allocation5], 4294967040 }
 0xc14   :  { %3005 = vsyncpa [#allocation4], 1 }
 0xc15   :  { %3006 = vsyncpa [#allocation7], 1 }
 0xc16   :  { %3007 = vsyncpa [#allocation10], 1 }
 0xc17   :  { %3008 = vsyncpa [#allocation5], 1 }

</bundles_post_ra>
